<compile_context>
chip_gen: v7x
topology: tpu7x:2x2x1
jax: 0.10.0
libtpu: 0.0.40
codegen_flags: <defaults>
</compile_context>

<pallas_src>
import numpy as np
import jax
import jax.numpy as jnp
from jax.experimental import pallas as pl
from jax.experimental.pallas import tpu as pltpu


# --------------------------------------------------------------------------
# Pallas kernel: FFNN(head), FFNN(tail), BiaffineAttention -> lane-dense logits
# --------------------------------------------------------------------------
def re_decoder_kernel(hseq_ref, hlbl_ref, tseq_ref, tlbl_ref,
                      w1h_ref, w2h_ref, b2h_ref,
                      w1t_ref, w2t_ref, b2t_ref,
                      wbil_ref, wlh_ref, wlt_ref, bl_ref,
                      out_ref):
    f32 = jnp.float32
    bf16 = jnp.bfloat16
    D = w2h_ref.shape[1]

    def ffnn(seq, lbl_part, w1, w2, b2):
        # Linear(2H->H): seq-part matmul + precomputed (label-part + b1) partial
        x = jnp.dot(seq, w1[...], preferred_element_type=f32) + lbl_part
        x = jnp.maximum(x, 0.0).astype(bf16)            # ReLU (+dropout=identity)
        y = jnp.dot(x, w2[...], preferred_element_type=f32) + b2[...]
        return jnp.maximum(y, 0.0)                      # (Rp, D) f32

    heads = ffnn(hseq_ref[0], hlbl_ref[0], w1h_ref, w2h_ref, b2h_ref)
    tails = ffnn(tseq_ref[0], tlbl_ref[0], w1t_ref, w2t_ref, b2t_ref)

    heads_b = heads.astype(bf16)
    tails_b = tails.astype(bf16)

    # Bilinear part, fused into one (Rp, 2D) matmul:
    #   z[n, o] = sum_{d,e} heads[n,d] * Wb[o,d,e] * tails[n,e]
    hb = jnp.dot(heads_b, wbil_ref[...], preferred_element_type=f32)   # (Rp, 2D)
    z0 = jnp.sum(hb[:, :D] * tails, axis=-1, keepdims=True)            # (Rp, 1)
    z1 = jnp.sum(hb[:, D:] * tails, axis=-1, keepdims=True)            # (Rp, 1)

    lane = jax.lax.broadcasted_iota(jnp.int32, (1, 128), 1)
    bil = jnp.where(lane == 0, z0, 0.0) + jnp.where(lane == 1, z1, 0.0)  # (Rp,128)

    # Linear part on cat(heads, tails); concat folded into two matmuls.
    # wlh/wlt/bl are zero-padded to 128 output lanes -> lanes 2.. stay zero.
    lin = (jnp.dot(heads_b, wlh_ref[...], preferred_element_type=f32)
           + jnp.dot(tails_b, wlt_ref[...], preferred_element_type=f32)
           + bl_ref[...])                                                # (Rp,128)

    out_ref[0] = bil + lin


def re_decoder_logits_batched(head_seq, head_lbl, tail_seq, tail_lbl, w):
    """One batched pallas_call. Inputs (B, Rp, H); returns (B, Rp, 128) f32."""
    B, Rp, H = head_seq.shape

    def item_spec():
        return pl.BlockSpec((1, Rp, H), lambda b: (b, 0, 0))

    def weight_spec(x):
        nd = x.ndim
        return pl.BlockSpec(x.shape, lambda b, nd=nd: (0,) * nd)

    inputs = (head_seq, head_lbl, tail_seq, tail_lbl,
              w["w1h"], w["w2h"], w["b2h"],
              w["w1t"], w["w2t"], w["b2t"],
              w["wbil2d"], w["wlh128"], w["wlt128"], w["bl128"])
    in_specs = [item_spec() for _ in range(4)] + [weight_spec(x) for x in inputs[4:]]

    return pl.pallas_call(
        re_decoder_kernel,
        out_shape=jax.ShapeDtypeStruct((B, Rp, 128), jnp.float32),
        grid=(B,),
        in_specs=in_specs,
        out_specs=pl.BlockSpec((1, Rp, 128), lambda b: (b, 0, 0)),
        compiler_params=pltpu.CompilerParams(
            dimension_semantics=("parallel",),          # megacore: shard batch
            vmem_limit_bytes=64 * 1024 * 1024),
    )(*inputs)


# --------------------------------------------------------------------------
# Host-side relation building (pure Python, same logic as the PyTorch code)
# --------------------------------------------------------------------------
def build_relation(relations, entities):
    batch_size = len(relations)
    entities = [dict(e) for e in entities]
    new_relations = []
    for b in range(batch_size):
        if len(entities[b]['start']) <= 2:
            entities[b] = {'end': [1, 1], 'label': [0, 0], 'start': [0, 0]}
        all_possible = set(
            (i, j)
            for i in range(len(entities[b]['label']))
            for j in range(len(entities[b]['label']))
            if entities[b]['label'][i] == 1 and entities[b]['label'][j] == 2)
        if len(all_possible) == 0:
            all_possible = {(0, 1)}
        positive = set(zip(relations[b]['head'], relations[b]['tail']))
        negative = all_possible - positive
        positive = set(i for i in positive if i in all_possible)
        reordered = list(positive) + list(negative)
        rel = {'head': [i[0] for i in reordered],
               'tail': [i[1] for i in reordered],
               'label': [1] * len(positive) + [0] * (len(reordered) - len(positive))}
        assert len(rel['head']) != 0
        new_relations.append(rel)
    return new_relations, entities


def get_predicted_relations(pred_labels, relations, entities):
    pred_relations = []
    for i, pred_label in enumerate(pred_labels):
        if pred_label != 1:
            continue
        rel = {}
        rel['head_id'] = relations['head'][i]
        rel['head'] = (entities['start'][rel['head_id']], entities['end'][rel['head_id']])
        rel['head_type'] = entities['label'][rel['head_id']]
        rel['tail_id'] = relations['tail'][i]
        rel['tail'] = (entities['start'][rel['tail_id']], entities['end'][rel['tail_id']])
        rel['tail_type'] = entities['label'][rel['tail_id']]
        rel['type'] = 1
        pred_relations.append(rel)
    return pred_relations


# --------------------------------------------------------------------------
# Parameter construction (deterministic, synthetic)
# --------------------------------------------------------------------------
def init_params(key, hidden_size, vocab_size):
    H = hidden_size
    D = H // 2
    ks = jax.random.split(key, 16)
    n = lambda k, shp, s=0.1: (s * jax.random.normal(k, shp)).astype(jnp.float32)
    params = {
        # stubbed backbone "model": word embedding encoder
        "word_emb": n(ks[0], (vocab_size, H)),
        # RegionExtractionDecoder
        "entity_emb": n(ks[1], (3, H)),
        # ffnn_head (weights stored already transposed: x @ W)
        "w1h": n(ks[2], (2 * H, H)), "b1h": n(ks[3], (1, H)),
        "w2h": n(ks[4], (H, D)),     "b2h": n(ks[5], (1, D)),
        # ffnn_tail
        "w1t": n(ks[6], (2 * H, H)), "b1t": n(ks[7], (1, H)),
        "w2t": n(ks[8], (H, D)),     "b2t": n(ks[9], (1, D)),
        # BiaffineAttention: bilinear weight (out=2, D, D) (bias=False), linear(2D -> 2)
        "wbil": n(ks[10], (2, D, D)),
        "wlh": n(ks[11], (D, 2)),
        "wlt": n(ks[12], (D, 2)),
        "bl": n(ks[13], (1, 2)),
    }
    return params


def prepare_decoder_weights(params):
    """Pre-packed, kernel-ready weight slabs (bf16 matmul weights, f32 biases)."""
    H = params["w1h"].shape[1]
    bf16 = jnp.bfloat16
    w = {}
    # first-layer split: top-H rows multiply the sequence part (inside kernel),
    # bottom-H rows only multiply entity_emb -> precompute (3, H) partials, with
    # the layer-1 bias folded in (one gather replaces concat + bias add).
    w["w1h"] = params["w1h"][:H].astype(bf16)
    w["w1t"] = params["w1t"][:H].astype(bf16)
    w["lbl_proj_h"] = jnp.dot(params["entity_emb"], params["w1h"][H:]) + params["b1h"]  # (3,H) f32
    w["lbl_proj_t"] = jnp.dot(params["entity_emb"], params["w1t"][H:]) + params["b1t"]  # (3,H) f32
    w["w2h"] = params["w2h"].astype(bf16)
    w["b2h"] = params["b2h"]
    w["w2t"] = params["w2t"].astype(bf16)
    w["b2t"] = params["b2t"]
    # bilinear (2, D, D) -> fused (D, 2D)
    w["wbil2d"] = jnp.concatenate([params["wbil"][0], params["wbil"][1]],
                                  axis=1).astype(bf16)
    # linear part padded to 128 output lanes (lane-dense store)
    w["wlh128"] = jnp.pad(params["wlh"], ((0, 0), (0, 126))).astype(bf16)
    w["wlt128"] = jnp.pad(params["wlt"], ((0, 0), (0, 126))).astype(bf16)
    w["bl128"] = jnp.pad(params["bl"], ((0, 0), (0, 126)))
    return w


# --------------------------------------------------------------------------
# Device-side batched decode + loss + argmax (one jitted call, one kernel)
# --------------------------------------------------------------------------
@jax.jit
def _decoder_device(w, sequence_output, hidx, hlab, tidx, tlab, labels, mask):
    bf16 = jnp.bfloat16
    head_seq = jnp.take_along_axis(sequence_output, hidx[..., None], axis=1).astype(bf16)
    tail_seq = jnp.take_along_axis(sequence_output, tidx[..., None], axis=1).astype(bf16)
    head_lbl = w["lbl_proj_h"][hlab]          # (B, Rp, H) f32 partial of layer-1 (+b1)
    tail_lbl = w["lbl_proj_t"][tlab]

    out128 = re_decoder_logits_batched(head_seq, head_lbl, tail_seq, tail_lbl, w)
    logits = out128[:, :, :2]                 # (B, Rp, 2)

    # cross-entropy: mean over valid rows per item, summed over batch
    lse = jax.scipy.special.logsumexp(logits, axis=-1)                   # (B, Rp)
    picked = jnp.take_along_axis(logits, labels[..., None], axis=-1)[..., 0]
    nll = lse - picked
    denom = jnp.maximum(jnp.sum(mask, axis=1), 1.0)
    total_loss = jnp.sum(jnp.sum(nll * mask, axis=1) / denom)

    preds = jnp.argmax(logits, axis=-1)       # (B, Rp)
    return total_loss, preds


# --------------------------------------------------------------------------
# Full forward pass: InfoXLMForRelationExtraction.forward
# --------------------------------------------------------------------------
def forward(params, input_ids, entities, relations):
    B, S = input_ids.shape
    # --- backbone (stub) + dropout (identity in eval) ---
    hidden_states = params["word_emb"][input_ids]            # (B, S, H)
    sequence_output = hidden_states[:, :S]                   # (B, S, H)

    # --- RegionExtractionDecoder ---
    relations, entities = build_relation(relations, entities)
    w = prepare_decoder_weights(params)

    # fixed MXU-friendly row padding (one compile per 128-bucket, not per R)
    max_R = max(len(r['head']) for r in relations)
    Rp = max(128, ((max_R + 127) // 128) * 128)

    hidx = np.zeros((B, Rp), np.int32)
    hlab = np.zeros((B, Rp), np.int32)
    tidx = np.zeros((B, Rp), np.int32)
    tlab = np.zeros((B, Rp), np.int32)
    labels = np.zeros((B, Rp), np.int32)
    mask = np.zeros((B, Rp), np.float32)
    R_list = []
    for b in range(B):
        heads_e = relations[b]['head']
        tails_e = relations[b]['tail']
        R = len(heads_e)
        R_list.append(R)
        ent_start = entities[b]['start']
        ent_label = entities[b]['label']
        hidx[b, :R] = [ent_start[i] for i in heads_e]
        hlab[b, :R] = [ent_label[i] for i in heads_e]
        tidx[b, :R] = [ent_start[i] for i in tails_e]
        tlab[b, :R] = [ent_label[i] for i in tails_e]
        labels[b, :R] = relations[b]['label']
        mask[b, :R] = 1.0

    total_loss, preds = _decoder_device(
        w, sequence_output,
        jnp.asarray(hidx), jnp.asarray(hlab),
        jnp.asarray(tidx), jnp.asarray(tlab),
        jnp.asarray(labels), jnp.asarray(mask))

    # single device->host pull for post-processing
    preds_np = np.asarray(jax.device_get(preds))
    all_pred_relations = []
    for b in range(B):
        all_pred_relations.append(
            get_predicted_relations(preds_np[b, :R_list[b]], relations[b], entities[b]))

    return total_loss, all_pred_relations, entities, relations, hidden_states


# --------------------------------------------------------------------------
if __name__ == "__main__":
    key = jax.random.PRNGKey(0)
    B, S, H, VOCAB = 2, 8, 32, 50

    k_params, k_ids = jax.random.split(key)
    params = init_params(k_params, H, VOCAB)
    input_ids = jax.random.randint(k_ids, (B, S), 0, VOCAB, dtype=jnp.int32)

    entities = [
        {'start': [0, 2, 4, 6], 'end': [1, 3, 5, 7], 'label': [1, 2, 1, 2]},
        {'start': [1, 3, 5],    'end': [2, 4, 6],    'label': [1, 2, 2]},
    ]
    relations = [
        {'head': [0, 2], 'tail': [1, 3]},
        {'head': [0],    'tail': [1]},
    ]

    loss, pred_relations, out_entities, out_relations, hidden = forward(
        params, input_ids, entities, relations)
    jax.block_until_ready(loss)
    print("KERNEL_OK")
</pallas_src>

<mosaic_0001>
module attributes {stable_mosaic.version = 11 : i64} {
  func.func @re_decoder_kernel(%arg0: i32, %arg1: memref<1x128x32xbf16, #tpu.memory_space<vmem>>, %arg2: memref<1x128x32xf32, #tpu.memory_space<vmem>>, %arg3: memref<1x128x32xbf16, #tpu.memory_space<vmem>>, %arg4: memref<1x128x32xf32, #tpu.memory_space<vmem>>, %arg5: memref<32x32xbf16, #tpu.memory_space<vmem>>, %arg6: memref<32x16xbf16, #tpu.memory_space<vmem>>, %arg7: memref<1x16xf32, #tpu.memory_space<vmem>>, %arg8: memref<32x32xbf16, #tpu.memory_space<vmem>>, %arg9: memref<32x16xbf16, #tpu.memory_space<vmem>>, %arg10: memref<1x16xf32, #tpu.memory_space<vmem>>, %arg11: memref<16x32xbf16, #tpu.memory_space<vmem>>, %arg12: memref<16x128xbf16, #tpu.memory_space<vmem>>, %arg13: memref<16x128xbf16, #tpu.memory_space<vmem>>, %arg14: memref<1x128xf32, #tpu.memory_space<vmem>>, %arg15: memref<1x128x128xf32, #tpu.memory_space<vmem>>) attributes {dimension_semantics = [#tpu.dimension_semantics<parallel>], iteration_bounds = array<i64: 2>, scalar_prefetch = 0 : i64, scratch_operands = 0 : i64, tpu.core_type = #tpu.core_type<tc>, window_params = [{transform_indices = @transform_0, window_bounds = array<i64: 1, 128, 32>}, {transform_indices = @transform_1, window_bounds = array<i64: 1, 128, 32>}, {transform_indices = @transform_2, window_bounds = array<i64: 1, 128, 32>}, {transform_indices = @transform_3, window_bounds = array<i64: 1, 128, 32>}, {pipeline_mode = #tpu.pipeline_mode<synchronous>, transform_indices = @transform_4, window_bounds = array<i64: 32, 32>}, {pipeline_mode = #tpu.pipeline_mode<synchronous>, transform_indices = @transform_5, window_bounds = array<i64: 32, 16>}, {pipeline_mode = #tpu.pipeline_mode<synchronous>, transform_indices = @transform_6, window_bounds = array<i64: 1, 16>}, {pipeline_mode = #tpu.pipeline_mode<synchronous>, transform_indices = @transform_7, window_bounds = array<i64: 32, 32>}, {pipeline_mode = #tpu.pipeline_mode<synchronous>, transform_indices = @transform_8, window_bounds = array<i64: 32, 16>}, {pipeline_mode = #tpu.pipeline_mode<synchronous>, transform_indices = @transform_9, window_bounds = array<i64: 1, 16>}, {pipeline_mode = #tpu.pipeline_mode<synchronous>, transform_indices = @transform_10, window_bounds = array<i64: 16, 32>}, {pipeline_mode = #tpu.pipeline_mode<synchronous>, transform_indices = @transform_11, window_bounds = array<i64: 16, 128>}, {pipeline_mode = #tpu.pipeline_mode<synchronous>, transform_indices = @transform_12, window_bounds = array<i64: 16, 128>}, {pipeline_mode = #tpu.pipeline_mode<synchronous>, transform_indices = @transform_13, window_bounds = array<i64: 1, 128>}, {transform_indices = @transform_14, window_bounds = array<i64: 1, 128, 128>}]} {
    %c0 = arith.constant 0 : index
    %c0_0 = arith.constant 0 : index
    %c0_1 = arith.constant 0 : index
    %0 = vector.load %arg1[%c0, %c0_0, %c0_1] : memref<1x128x32xbf16, #tpu.memory_space<vmem>>, vector<1x128x32xbf16>
    %1 = vector.shape_cast %0 : vector<1x128x32xbf16> to vector<128x32xbf16>
    %c0_2 = arith.constant 0 : index
    %c0_3 = arith.constant 0 : index
    %c0_4 = arith.constant 0 : index
    %2 = vector.load %arg2[%c0_2, %c0_3, %c0_4] : memref<1x128x32xf32, #tpu.memory_space<vmem>>, vector<1x128x32xf32>
    %3 = vector.shape_cast %2 : vector<1x128x32xf32> to vector<128x32xf32>
    %c0_5 = arith.constant 0 : index
    %c0_6 = arith.constant 0 : index
    %4 = vector.load %arg5[%c0_5, %c0_6] : memref<32x32xbf16, #tpu.memory_space<vmem>>, vector<32x32xbf16>
    %cst = arith.constant dense<0.000000e+00> : vector<128x32xf32>
    %5 = tpu.matmul %1, %4, %cst {dimension_numbers = #tpu.dot_dimension_numbers<[1], [0], [0], [1], [0, 0, 1, 1], [], []>} : vector<128x32xbf16>, vector<32x32xbf16>, vector<128x32xf32> -> vector<128x32xf32>
    %6 = arith.addf %5, %3 : vector<128x32xf32>
    %cst_7 = arith.constant 0.000000e+00 : f32
    %7 = vector.broadcast %cst_7 : f32 to vector<128x32xf32>
    %8 = arith.maximumf %6, %7 : vector<128x32xf32>
    %9 = arith.truncf %8 : vector<128x32xf32> to vector<128x32xbf16>
    %c0_8 = arith.constant 0 : index
    %c0_9 = arith.constant 0 : index
    %10 = vector.load %arg6[%c0_8, %c0_9] : memref<32x16xbf16, #tpu.memory_space<vmem>>, vector<32x16xbf16>
    %cst_10 = arith.constant dense<0.000000e+00> : vector<128x16xf32>
    %11 = tpu.matmul %9, %10, %cst_10 {dimension_numbers = #tpu.dot_dimension_numbers<[1], [0], [0], [1], [0, 0, 1, 1], [], []>} : vector<128x32xbf16>, vector<32x16xbf16>, vector<128x16xf32> -> vector<128x16xf32>
    %c0_11 = arith.constant 0 : index
    %c0_12 = arith.constant 0 : index
    %12 = vector.load %arg7[%c0_11, %c0_12] : memref<1x16xf32, #tpu.memory_space<vmem>>, vector<1x16xf32>
    %13 = vector.broadcast %12 : vector<1x16xf32> to vector<128x16xf32>
    %14 = arith.addf %11, %13 : vector<128x16xf32>
    %cst_13 = arith.constant 0.000000e+00 : f32
    %15 = vector.broadcast %cst_13 : f32 to vector<128x16xf32>
    %16 = arith.maximumf %14, %15 : vector<128x16xf32>
    %c0_14 = arith.constant 0 : index
    %c0_15 = arith.constant 0 : index
    %c0_16 = arith.constant 0 : index
    %17 = vector.load %arg3[%c0_14, %c0_15, %c0_16] : memref<1x128x32xbf16, #tpu.memory_space<vmem>>, vector<1x128x32xbf16>
    %18 = vector.shape_cast %17 : vector<1x128x32xbf16> to vector<128x32xbf16>
    %c0_17 = arith.constant 0 : index
    %c0_18 = arith.constant 0 : index
    %c0_19 = arith.constant 0 : index
    %19 = vector.load %arg4[%c0_17, %c0_18, %c0_19] : memref<1x128x32xf32, #tpu.memory_space<vmem>>, vector<1x128x32xf32>
    %20 = vector.shape_cast %19 : vector<1x128x32xf32> to vector<128x32xf32>
    %c0_20 = arith.constant 0 : index
    %c0_21 = arith.constant 0 : index
    %21 = vector.load %arg8[%c0_20, %c0_21] : memref<32x32xbf16, #tpu.memory_space<vmem>>, vector<32x32xbf16>
    %cst_22 = arith.constant dense<0.000000e+00> : vector<128x32xf32>
    %22 = tpu.matmul %18, %21, %cst_22 {dimension_numbers = #tpu.dot_dimension_numbers<[1], [0], [0], [1], [0, 0, 1, 1], [], []>} : vector<128x32xbf16>, vector<32x32xbf16>, vector<128x32xf32> -> vector<128x32xf32>
    %23 = arith.addf %22, %20 : vector<128x32xf32>
    %cst_23 = arith.constant 0.000000e+00 : f32
    %24 = vector.broadcast %cst_23 : f32 to vector<128x32xf32>
    %25 = arith.maximumf %23, %24 : vector<128x32xf32>
    %26 = arith.truncf %25 : vector<128x32xf32> to vector<128x32xbf16>
    %c0_24 = arith.constant 0 : index
    %c0_25 = arith.constant 0 : index
    %27 = vector.load %arg9[%c0_24, %c0_25] : memref<32x16xbf16, #tpu.memory_space<vmem>>, vector<32x16xbf16>
    %cst_26 = arith.constant dense<0.000000e+00> : vector<128x16xf32>
    %28 = tpu.matmul %26, %27, %cst_26 {dimension_numbers = #tpu.dot_dimension_numbers<[1], [0], [0], [1], [0, 0, 1, 1], [], []>} : vector<128x32xbf16>, vector<32x16xbf16>, vector<128x16xf32> -> vector<128x16xf32>
    %c0_27 = arith.constant 0 : index
    %c0_28 = arith.constant 0 : index
    %29 = vector.load %arg10[%c0_27, %c0_28] : memref<1x16xf32, #tpu.memory_space<vmem>>, vector<1x16xf32>
    %30 = vector.broadcast %29 : vector<1x16xf32> to vector<128x16xf32>
    %31 = arith.addf %28, %30 : vector<128x16xf32>
    %cst_29 = arith.constant 0.000000e+00 : f32
    %32 = vector.broadcast %cst_29 : f32 to vector<128x16xf32>
    %33 = arith.maximumf %31, %32 : vector<128x16xf32>
    %34 = arith.truncf %16 : vector<128x16xf32> to vector<128x16xbf16>
    %35 = arith.truncf %33 : vector<128x16xf32> to vector<128x16xbf16>
    %c0_30 = arith.constant 0 : index
    %c0_31 = arith.constant 0 : index
    %36 = vector.load %arg11[%c0_30, %c0_31] : memref<16x32xbf16, #tpu.memory_space<vmem>>, vector<16x32xbf16>
    %cst_32 = arith.constant dense<0.000000e+00> : vector<128x32xf32>
    %37 = tpu.matmul %34, %36, %cst_32 {dimension_numbers = #tpu.dot_dimension_numbers<[1], [0], [0], [1], [0, 0, 1, 1], [], []>} : vector<128x16xbf16>, vector<16x32xbf16>, vector<128x32xf32> -> vector<128x32xf32>
    %38 = vector.extract_strided_slice %37 {offsets = [0, 0], sizes = [128, 16], strides = [1, 1]} : vector<128x32xf32> to vector<128x16xf32>
    %39 = arith.mulf %38, %33 : vector<128x16xf32>
    %cst_33 = arith.constant dense<0.000000e+00> : vector<128xf32>
    %40 = vector.multi_reduction <add>, %39, %cst_33 [1] : vector<128x16xf32> to vector<128xf32>
    %41 = vector.shape_cast %40 : vector<128xf32> to vector<128x1xf32>
    %42 = vector.extract_strided_slice %37 {offsets = [0, 16], sizes = [128, 16], strides = [1, 1]} : vector<128x32xf32> to vector<128x16xf32>
    %43 = arith.mulf %42, %33 : vector<128x16xf32>
    %cst_34 = arith.constant dense<0.000000e+00> : vector<128xf32>
    %44 = vector.multi_reduction <add>, %43, %cst_34 [1] : vector<128x16xf32> to vector<128xf32>
    %45 = vector.shape_cast %44 : vector<128xf32> to vector<128x1xf32>
    %46 = tpu.iota {dimensions = array<i32: 1>} : vector<1x128xi32>
    %c0_i32 = arith.constant 0 : i32
    %47 = vector.broadcast %c0_i32 : i32 to vector<1x128xi32>
    %48 = arith.cmpi eq, %46, %47 : vector<1x128xi32>
    %cst_35 = arith.constant 0.000000e+00 : f32
    %49 = vector.shape_cast %48 : vector<1x128xi1> to vector<1x128xi1>
    %50 = vector.broadcast %49 : vector<1x128xi1> to vector<128x128xi1>
    %51 = vector.shape_cast %41 : vector<128x1xf32> to vector<128x1xf32>
    %52 = vector.broadcast %51 : vector<128x1xf32> to vector<128x128xf32>
    %53 = vector.broadcast %cst_35 : f32 to vector<128x128xf32>
    %54 = arith.select %50, %52, %53 : vector<128x128xi1>, vector<128x128xf32>
    %c1_i32 = arith.constant 1 : i32
    %55 = vector.broadcast %c1_i32 : i32 to vector<1x128xi32>
    %56 = arith.cmpi eq, %46, %55 : vector<1x128xi32>
    %cst_36 = arith.constant 0.000000e+00 : f32
    %57 = vector.shape_cast %56 : vector<1x128xi1> to vector<1x128xi1>
    %58 = vector.broadcast %57 : vector<1x128xi1> to vector<128x128xi1>
    %59 = vector.shape_cast %45 : vector<128x1xf32> to vector<128x1xf32>
    %60 = vector.broadcast %59 : vector<128x1xf32> to vector<128x128xf32>
    %61 = vector.broadcast %cst_36 : f32 to vector<128x128xf32>
    %62 = arith.select %58, %60, %61 : vector<128x128xi1>, vector<128x128xf32>
    %63 = arith.addf %54, %62 : vector<128x128xf32>
    %c0_37 = arith.constant 0 : index
    %c0_38 = arith.constant 0 : index
    %64 = vector.load %arg12[%c0_37, %c0_38] : memref<16x128xbf16, #tpu.memory_space<vmem>>, vector<16x128xbf16>
    %cst_39 = arith.constant dense<0.000000e+00> : vector<128x128xf32>
    %65 = tpu.matmul %34, %64, %cst_39 {dimension_numbers = #tpu.dot_dimension_numbers<[1], [0], [0], [1], [0, 0, 1, 1], [], []>} : vector<128x16xbf16>, vector<16x128xbf16>, vector<128x128xf32> -> vector<128x128xf32>
    %c0_40 = arith.constant 0 : index
    %c0_41 = arith.constant 0 : index
    %66 = vector.load %arg13[%c0_40, %c0_41] : memref<16x128xbf16, #tpu.memory_space<vmem>>, vector<16x128xbf16>
    %cst_42 = arith.constant dense<0.000000e+00> : vector<128x128xf32>
    %67 = tpu.matmul %35, %66, %cst_42 {dimension_numbers = #tpu.dot_dimension_numbers<[1], [0], [0], [1], [0, 0, 1, 1], [], []>} : vector<128x16xbf16>, vector<16x128xbf16>, vector<128x128xf32> -> vector<128x128xf32>
    %68 = arith.addf %65, %67 : vector<128x128xf32>
    %c0_43 = arith.constant 0 : index
    %c0_44 = arith.constant 0 : index
    %69 = vector.load %arg14[%c0_43, %c0_44] : memref<1x128xf32, #tpu.memory_space<vmem>>, vector<1x128xf32>
    %70 = vector.broadcast %69 : vector<1x128xf32> to vector<128x128xf32>
    %71 = arith.addf %68, %70 : vector<128x128xf32>
    %72 = arith.addf %63, %71 : vector<128x128xf32>
    %c0_45 = arith.constant 0 : index
    %c0_46 = arith.constant 0 : index
    %c0_47 = arith.constant 0 : index
    %73 = vector.load %arg15[%c0_45, %c0_46, %c0_47] : memref<1x128x128xf32, #tpu.memory_space<vmem>>, vector<1x128x128xf32>
    %74 = vector.shape_cast %73 : vector<1x128x128xf32> to vector<128x128xf32>
    %75 = vector.shape_cast %72 : vector<128x128xf32> to vector<1x128x128xf32>
    tpu.vector_store %arg15[%c0_45, %c0_46, %c0_47], %75 {strides = array<i32>} : memref<1x128x128xf32, #tpu.memory_space<vmem>>, vector<1x128x128xf32>,
    return
  }
  func.func @transform_0(%arg0: i32) -> (i32, i32, i32) {
    %c0_i32 = arith.constant 0 : i32
    %c0_i32_0 = arith.constant 0 : i32
    %c0_i32_1 = arith.constant 0 : i32
    return %arg0, %c0_i32, %c0_i32_0 : i32, i32, i32
  }
  func.func @transform_1(%arg0: i32) -> (i32, i32, i32) {
    %c0_i32 = arith.constant 0 : i32
    %c0_i32_0 = arith.constant 0 : i32
    %c0_i32_1 = arith.constant 0 : i32
    return %arg0, %c0_i32, %c0_i32_0 : i32, i32, i32
  }
  func.func @transform_2(%arg0: i32) -> (i32, i32, i32) {
    %c0_i32 = arith.constant 0 : i32
    %c0_i32_0 = arith.constant 0 : i32
    %c0_i32_1 = arith.constant 0 : i32
    return %arg0, %c0_i32, %c0_i32_0 : i32, i32, i32
  }
  func.func @transform_3(%arg0: i32) -> (i32, i32, i32) {
    %c0_i32 = arith.constant 0 : i32
    %c0_i32_0 = arith.constant 0 : i32
    %c0_i32_1 = arith.constant 0 : i32
    return %arg0, %c0_i32, %c0_i32_0 : i32, i32, i32
  }
  func.func @transform_4(%arg0: i32) -> (i32, i32) {
    %c0_i32 = arith.constant 0 : i32
    %c0_i32_0 = arith.constant 0 : i32
    %c0_i32_1 = arith.constant 0 : i32
    return %c0_i32, %c0_i32_0 : i32, i32
  }
  func.func @transform_5(%arg0: i32) -> (i32, i32) {
    %c0_i32 = arith.constant 0 : i32
    %c0_i32_0 = arith.constant 0 : i32
    %c0_i32_1 = arith.constant 0 : i32
    return %c0_i32, %c0_i32_0 : i32, i32
  }
  func.func @transform_6(%arg0: i32) -> (i32, i32) {
    %c0_i32 = arith.constant 0 : i32
    %c0_i32_0 = arith.constant 0 : i32
    %c0_i32_1 = arith.constant 0 : i32
    return %c0_i32, %c0_i32_0 : i32, i32
  }
  func.func @transform_7(%arg0: i32) -> (i32, i32) {
    %c0_i32 = arith.constant 0 : i32
    %c0_i32_0 = arith.constant 0 : i32
    %c0_i32_1 = arith.constant 0 : i32
    return %c0_i32, %c0_i32_0 : i32, i32
  }
  func.func @transform_8(%arg0: i32) -> (i32, i32) {
    %c0_i32 = arith.constant 0 : i32
    %c0_i32_0 = arith.constant 0 : i32
    %c0_i32_1 = arith.constant 0 : i32
    return %c0_i32, %c0_i32_0 : i32, i32
  }
  func.func @transform_9(%arg0: i32) -> (i32, i32) {
    %c0_i32 = arith.constant 0 : i32
    %c0_i32_0 = arith.constant 0 : i32
    %c0_i32_1 = arith.constant 0 : i32
    return %c0_i32, %c0_i32_0 : i32, i32
  }
  func.func @transform_10(%arg0: i32) -> (i32, i32) {
    %c0_i32 = arith.constant 0 : i32
    %c0_i32_0 = arith.constant 0 : i32
    %c0_i32_1 = arith.constant 0 : i32
    return %c0_i32, %c0_i32_0 : i32, i32
  }
  func.func @transform_11(%arg0: i32) -> (i32, i32) {
    %c0_i32 = arith.constant 0 : i32
    %c0_i32_0 = arith.constant 0 : i32
    %c0_i32_1 = arith.constant 0 : i32
    return %c0_i32, %c0_i32_0 : i32, i32
  }
  func.func @transform_12(%arg0: i32) -> (i32, i32) {
    %c0_i32 = arith.constant 0 : i32
    %c0_i32_0 = arith.constant 0 : i32
    %c0_i32_1 = arith.constant 0 : i32
    return %c0_i32, %c0_i32_0 : i32, i32
  }
  func.func @transform_13(%arg0: i32) -> (i32, i32) {
    %c0_i32 = arith.constant 0 : i32
    %c0_i32_0 = arith.constant 0 : i32
    %c0_i32_1 = arith.constant 0 : i32
    return %c0_i32, %c0_i32_0 : i32, i32
  }
  func.func @transform_14(%arg0: i32) -> (i32, i32, i32) {
    %c0_i32 = arith.constant 0 : i32
    %c0_i32_0 = arith.constant 0 : i32
    %c0_i32_1 = arith.constant 0 : i32
    return %arg0, %c0_i32, %c0_i32_0 : i32, i32, i32
  }
}

</mosaic_0001>

<bundles_post_ra>
// kernel: _decoder_device.1
= control target key start
LH: loop header
LB: loop body
LE: loop exit
PB: predicated region body
PF: predicated region fallthrough
CT: control target
= control target key end

     0   :  { %s4826_s0 = inlined_call_operand.hbm [shape: bf16[2,128,32], index: 0, kind: input, shape index: {}]   ;;  %s4827_s1 = inlined_call_operand.hbm [shape: f32[2,128,32], index: 1, kind: input, shape index: {}]   ;;  %s4828_s2 = inlined_call_operand.hbm [shape: bf16[2,128,32], index: 2, kind: input, shape index: {}]   ;;  %s4829_s3 = inlined_call_operand.hbm [shape: f32[2,128,32], index: 3, kind: input, shape index: {}]   ;;  %s4830_s4 = inlined_call_operand.hbm [shape: bf16[32,32], index: 4, kind: input, shape index: {}]   ;;  %s4831_s5 = inlined_call_operand.hbm [shape: bf16[32,16], index: 5, kind: input, shape index: {}]   ;;  %s4832_s6 = inlined_call_operand.hbm [shape: f32[1,16], index: 6, kind: input, shape index: {}]   ;;  %s4833_s7 = inlined_call_operand.hbm [shape: bf16[32,32], index: 7, kind: input, shape index: {}]   ;;  %s4834_s8 = inlined_call_operand.hbm [shape: bf16[32,16], index: 8, kind: input, shape index: {}]   ;;  %s4835_s9 = inlined_call_operand.hbm [shape: f32[1,16], index: 9, kind: input, shape index: {}]   ;;  %s4836_s10 = inlined_call_operand.hbm [shape: bf16[16,32], index: 10, kind: input, shape index: {}]   ;;  %s4837_s11 = inlined_call_operand.hbm [shape: bf16[16,128], index: 11, kind: input, shape index: {}]   ;;  %s4838_s12 = inlined_call_operand.hbm [shape: bf16[16,128], index: 12, kind: input, shape index: {}]   ;;  %s4839_s13 = inlined_call_operand.hbm [shape: f32[1,128], index: 13, kind: input, shape index: {}]   ;;  %s4840_s14 = inlined_call_operand.hbm [shape: f32[2,128,128], index: 14, kind: output, shape index: {}]  }
   0x1   :  { %4877 = sst [smem:[#allocation43_spill]] %s4826_s0 }
   0x2   :  { %4878 = sst [smem:[#allocation44_spill]] %s4827_s1 }
   0x3   :  { %4879 = sst [smem:[#allocation45_spill]] %s4828_s2 }
   0x4   :  { %4880 = sst [smem:[#allocation46_spill]] %s4830_s4 }
   0x5   :  { %4881 = sst [smem:[#allocation47_spill]] %s4831_s5 }
   0x6   :  { %4882 = sst [smem:[#allocation48_spill]] %s4832_s6 }
   0x7   :  { %4883 = sst [smem:[#allocation49_spill]] %s4833_s7 }
   0x8   :  { %4884 = sst [smem:[#allocation50_spill]] %s4834_s8 }
   0x9   :  { %4885 = sst [smem:[#allocation51_spill]] %s4835_s9 }
   0xa   :  { %4886 = sst [smem:[#allocation52_spill]] %s4837_s11 }
   0xb   :  { %4887 = sst [smem:[#allocation53_spill]] %s4838_s12 }
   0xc   :  { %4888 = sst [smem:[#allocation54_spill]] %s4839_s13 }
   0xd   :  { %4889 = sst [smem:[#allocation55_spill]] %s4840_s14 }
   0xe   :  { %19 = vsyncpa [#allocation3], 0 }
   0xf   :  { %21 = vsyncpa [#allocation3 + $0x1], 0 }
  0x10   :  { %22 = vsyncpa [#allocation6], 0 }
  0x11   :  { %24 = vsyncpa [#allocation6 + $0x1], 0 }
  0x12   :  { %25 = vsyncpa [#allocation9], 0 }
  0x13   :  { %27 = vsyncpa [#allocation9 + $0x1], 0 }
  0x14   :  { %28 = vsyncpa [#allocation12], 0 }
  0x15   :  { %29 = vsyncpa [#allocation15], 0 }
  0x16   :  { %30 = vsyncpa [#allocation18], 0 }
  0x17   :  { %31 = vsyncpa [#allocation21], 0 }
  0x18   :  { %32 = vsyncpa [#allocation24], 0 }
  0x19   :  { %33 = vsyncpa [#allocation4], 0 }
  0x1a   :  { %35 = vsyncpa [#allocation4 + $0x1], 0  ;;  %s3678_s29 = smov 0   ;;  %s3680_s30 = smov 0  }
  0x1b   :  { %s3682_s15 = smov 0   ;;  %s3684_s16 = smov 0  }
  0x1c LB: > { %4890 = sst [smem:[#allocation36_spill]] %s3566_s29  ;;  %s3580_s17 = smov [#allocation10]   ;;  %s3578_s16 = sphi %s3684_s16, %s4954_s16   ;;  %s3574_s15 = sphi %s3682_s15, %s4956_s15   ;;  %s3570_s30 = sphi %s3680_s30, %s4958_s30   ;;  %s3566_s29 = sphi %s3678_s29, %s4957_s29  }
  0x1d   : > { %4891 = sst [smem:[#allocation37_spill]] %s3574_s15  ;;  %s398_s18 = sshll.u32 %s3580_s17, 4  ;;  %s3704_s18 = int_to_ptr.vmem [resolvable:$true] %s398_s18 }
  0x1e   : > { %s3699_s19 = sadd.s32 4294967295, %s3578_s16   ;;  %p2526_p0 = scmp.ge.s32.totalorder %s3578_s16, 1 }
  0x1f   : > { %p4847_p1 = scmp.eq.s32.totalorder %s3699_s19, 0  ;;  %p386_p2 = scmp.lt.s32.totalorder %s3578_s16, 3 }
  0x20   : > { %s3581_s21 = smov [#allocation11]   ;;  %s3582_s24 = smov [#allocation14]  }
  0x21   : > { %p3706_p3 = pnand %p2526_p0, %p386_p2  ;;  %s411_s22 = sshll.u32 %s3581_s21, 4  ;;  %s3719_s22 = int_to_ptr.vmem [resolvable:$true] %s411_s22 }
  0x22   : > { %s435_s25 = sshll.u32 %s3582_s24, 4  ;;  %s4895_s4 = sld [smem:[#allocation46_spill]]  ;;  %s3721_s25 = int_to_ptr.vmem [resolvable:$true] %s435_s25 }
  0x23   : > { %s4892_s20 = scalar_select %p3706_p3, 1, 0 }
  0x24   : > { %p2933_p5 = pneg %p3706_p3 }
  0x25   : > { %4893 = sst [smem:[#allocation38_spill]] %s4892_s20 }
  0x26   : > { %p3715_p6 = pnand %p2933_p5, %p4847_p1 }
  0x28   : > { %s4894_s23 = scalar_select %p3715_p6, 1, 0 }
  0x29   : > { %s3080_s28 = scalar_lea.hbm %s4895_s4, 256  ;;  %p3731_p8 = pneg %p3715_p6 }
  0x2a   : > { %p3081_p7 = scmp.ne.s32.totalorder %s4895_s4, %s3080_s28  ;;  %p3087_p11 = scmp.lt.u32.totalorder %s3080_s28, %s4895_s4 }
  0x2b   : > { %s4896_s21 = scalar_select %p3731_p8, 1, 0 }
  0x2c   : > { %p3083_p9 = pnand %p3731_p8, %p3081_p7 }
  0x2e   : > { %p3084_p10 = pneg %p3083_p9 }
  0x30   : > { %p3089_p12 = pnand %p3087_p11, %p3084_p10 }
  0x32   : > { %3092 = shalt.err (!%p3089_p12)
}
  0x33   : > { %s3093_s14 = scalar_lea.vmem %s3704_s18, 256  ;;  %p3101_p5 = scmp.lt.s32.totalorder %s3704_s18, %s3704_s18 }
  0x34   : > { %p3094_p13 = scmp.ne.s32.totalorder %s3704_s18, %s3093_s14  ;;  %p3102_p4 = scmp.lt.s32.totalorder %s3093_s14, %s3093_s14 }
  0x36   : > { %p3096_p0 = pnand %p3094_p13, %p3731_p8  ;;  %p3103_p7 = por %p3102_p4, %p3101_p5 }
  0x38   : > { %p3097_p2 = pneg %p3096_p0 }
  0x3a   : > { %p3104_p9 = pnand %p3103_p7, %p3097_p2 }
  0x3c   : > { %3107 = shalt.err (!%p3104_p9)
}
  0x3d   : > { %s4849_s26 = smov 64   ;;  %s4851_s20 = smov 4  }
  0x3e   : > { %2936 = dma.hbm_to_vmem [thread:$0]  (!%p3715_p6), %s4895_s4, 256, %s3704_s18, [#allocation9], %s4849_s26, %s4849_s26, %s4851_s20  }
  0x3f   : > { %s4897_s5 = sld [smem:[#allocation47_spill]] }
  0x45   : > { %s3108_s14 = scalar_lea.hbm %s4897_s5, 256 }
  0x46   : > { %p3109_p4 = scmp.ne.s32.totalorder %s4897_s5, %s3108_s14  ;;  %p3115_p12 = scmp.lt.u32.totalorder %s3108_s14, %s4897_s5 }
  0x48   : > { %p3111_p10 = pnand %p3109_p4, %p3731_p8 }
  0x4a   : > { %p3112_p11 = pneg %p3111_p10 }
  0x4c   : > { %p3117_p13 = pnand %p3115_p12, %p3112_p11 }
  0x4e   : > { %3120 = shalt.err (!%p3117_p13)
}
  0x4f   : > { %s3121_s18 = scalar_lea.vmem %s3719_s22, 256  ;;  %p3129_p7 = scmp.lt.s32.totalorder %s3719_s22, %s3719_s22 }
  0x50   : > { %p3122_p0 = scmp.ne.s32.totalorder %s3719_s22, %s3121_s18  ;;  %p3130_p9 = scmp.lt.s32.totalorder %s3121_s18, %s3121_s18 }
  0x52   : > { %p3124_p2 = pnand %p3122_p0, %p3731_p8  ;;  %p3131_p4 = por %p3130_p9, %p3129_p7 }
  0x54   : > { %p3125_p5 = pneg %p3124_p2 }
  0x56   : > { %p3132_p10 = pnand %p3131_p4, %p3125_p5 }
  0x58   : > { %3135 = shalt.err (!%p3132_p10)
}
  0x59   : > { %2939 = dma.hbm_to_vmem [thread:$0]  (!%p3715_p6), %s4897_s5, 256, %s3719_s22, [#allocation12], %s4849_s26, %s4849_s26, %s4851_s20  }
  0x5a   : > { %s4898_s7 = sld [smem:[#allocation49_spill]] }
  0x60   : > { %s3136_s27 = scalar_lea.hbm %s4898_s7, 256 }
  0x61   : > { %p3137_p11 = scmp.ne.s32.totalorder %s4898_s7, %s3136_s27  ;;  %p3143_p0 = scmp.lt.u32.totalorder %s3136_s27, %s4898_s7 }
  0x63   : > { %p3139_p12 = pnand %p3137_p11, %p3731_p8 }
  0x65   : > { %p3140_p13 = pneg %p3139_p12 }
  0x67   : > { %p3145_p2 = pnand %p3143_p0, %p3140_p13 }
  0x69   : > { %3148 = shalt.err (!%p3145_p2)
}
  0x6a   : > { %s3149_s22 = scalar_lea.vmem %s3721_s25, 256  ;;  %p3157_p4 = scmp.lt.s32.totalorder %s3721_s25, %s3721_s25 }
  0x6b   : > { %p3150_p5 = scmp.ne.s32.totalorder %s3721_s25, %s3149_s22  ;;  %p3158_p10 = scmp.lt.s32.totalorder %s3149_s22, %s3149_s22 }
  0x6d   : > { %p3152_p7 = pnand %p3150_p5, %p3731_p8  ;;  %p3159_p11 = por %p3158_p10, %p3157_p4 }
  0x6f   : > { %p3153_p9 = pneg %p3152_p7 }
  0x71   : > { %p3160_p12 = pnand %p3159_p11, %p3153_p9 }
  0x73   : > { %3163 = shalt.err (!%p3160_p12)
}
  0x74   : > { %2945 = dma.hbm_to_vmem [thread:$0]  (!%p3715_p6), %s4898_s7, 256, %s3721_s25, [#allocation15], %s4849_s26, %s4849_s26, %s4851_s20  }
  0x75   : > { %s3585_s2 = smov [#allocation17]   ;;  %s3586_s13 = smov [#allocation20]  }
  0x76   : > { %s462_s12 = sshll.u32 %s3585_s2, 4  ;;  %s485_s27 = sshll.u32 %s3586_s13, 4  ;;  %s463_s12 = int_to_ptr.vmem [resolvable:$true] %s462_s12  ;;  %s486_s27 = int_to_ptr.vmem [resolvable:$true] %s485_s27 }
  0x77   : > { %s4899_s9 = sld [smem:[#allocation51_spill]] }
  0x7d   : > { %s3164_s24 = scalar_lea.hbm %s4899_s9, 16 }
  0x7e   : > { %p3165_p13 = scmp.ne.s32.totalorder %s4899_s9, %s3164_s24  ;;  %p3171_p5 = scmp.lt.u32.totalorder %s3164_s24, %s4899_s9 }
  0x80   : > { %p3167_p0 = pnand %p3165_p13, %p3731_p8 }
  0x82   : > { %p3168_p2 = pneg %p3167_p0 }
  0x84   : > { %p3173_p7 = pnand %p3171_p5, %p3168_p2 }
  0x86   : > { %3176 = shalt.err (!%p3173_p7)
}
  0x87   : > { %s3177_s25 = scalar_lea.vmem %s463_s12, 16  ;;  %s3184_s0 = scalar_lea.vmem %s463_s12, 32 }
  0x88   : > { %p3178_p9 = scmp.ne.s32.totalorder %s463_s12, %s3177_s25  ;;  %p3185_p11 = scmp.lt.s32.totalorder %s463_s12, %s463_s12 }
  0x89   : > { %p3186_p12 = scmp.lt.s32.totalorder %s3184_s0, %s3177_s25 }
  0x8a   : > { %p3180_p4 = pnand %p3178_p9, %p3731_p8 }
  0x8b   : > { %p3187_p1 = por %p3186_p12, %p3185_p11 }
  0x8c   : > { %p3181_p10 = pneg %p3180_p4 }
  0x8e   : > { %p3188_p3 = pnand %p3187_p1, %p3181_p10 }
  0x90   : > { %3191 = shalt.err (!%p3188_p3)
}
  0x91   : > { %2951 = dma.hbm_to_vmem [thread:$0]  (!%p3715_p6), %s4899_s9, 16, %s463_s12, [#allocation18]  }
  0x92   : > { %s4900_s11 = sld [smem:[#allocation52_spill]] }
  0x98   : > { %s3192_s17 = scalar_lea.hbm %s4900_s11, 128 }
  0x99   : > { %p3193_p13 = scmp.ne.s32.totalorder %s4900_s11, %s3192_s17  ;;  %p3199_p3 = scmp.lt.u32.totalorder %s3192_s17, %s4900_s11 }
  0x9b   : > { %p3195_p0 = pnand %p3193_p13, %p3731_p8 }
  0x9d   : > { %p3196_p1 = pneg %p3195_p0 }
  0x9f   : > { %p3201_p2 = pnand %p3199_p3, %p3196_p1 }
  0xa1   : > { %3204 = shalt.err (!%p3201_p2)
}
  0xa2   : > { %s3205_s25 = scalar_lea.vmem %s486_s27, 128  ;;  %p3213_p4 = scmp.lt.s32.totalorder %s486_s27, %s486_s27 }
  0xa3   : > { %p3206_p5 = scmp.ne.s32.totalorder %s486_s27, %s3205_s25  ;;  %p3214_p10 = scmp.lt.s32.totalorder %s3205_s25, %s3205_s25 }
  0xa5   : > { %p3208_p7 = pnand %p3206_p5, %p3731_p8  ;;  %p3215_p11 = por %p3214_p10, %p3213_p4 }
  0xa7   : > { %p3209_p9 = pneg %p3208_p7 }
  0xa9   : > { %p3216_p12 = pnand %p3215_p11, %p3209_p9 }
  0xab   : > { %3219 = shalt.err (!%p3216_p12)
}
  0xac   : > { %2957 = dma.hbm_to_vmem [thread:$0]  (!%p3715_p6), %s4900_s11, 128, %s486_s27, [#allocation21], %s4849_s26, %s4849_s26, %s4851_s20  }
  0xad   : > { %s2525_s2 = sadd.s32 4294967294, %s3578_s16   ;;  %s3848_s13 = sadd.s32 1, %s3578_s16  }
  0xae   : > { %4901 = sst [smem:[#allocation39_spill]] %s3848_s13  ;;  %s48_s4 = sadd.s32 1, %s3574_s15 }
  0xaf   : > { %s45_s28 = ssub.s32 %s3578_s16, %s3848_s13  ;;  %p55_p13 = scmp.ne.s32.totalorder %s3574_s15, %s3570_s30 }
  0xb0   : > { %p46_p0 = scmp.eq.s32.totalorder %s45_s28, 0  ;;  %p56_p1 = scmp.eq.s32.totalorder %s3578_s16, 0 }
  0xb1   : > { %p61_p3 = scmp.ne.s32.totalorder %s3570_s30, %s3566_s29  ;;  %p373_p2 = scmp.eq.s32.totalorder %s3699_s19, 1 }
  0xb2   : > { %s3860_s17 = scalar_select %p46_p0, %s3574_s15, %s48_s4  }
  0xb3   : > { %p57_p5 = por %p56_p1, %p55_p13  ;;  %p4903_p7 = scmp.eq.s32.totalorder %s3699_s19, 0 }
  0xb4   : > { %4902 = sst [smem:[#allocation40_spill]] %s3860_s17  ;;  %p3868_p4 = por %p373_p2, %p55_p13 }
  0xb5   : > { %p3864_p9 = por %p4903_p7, %p61_p3  ;;  %p379_p10 = scmp.eq.s32.totalorder %s2525_s2, 1 }
  0xb6   : > { %s4905_s24 = scalar_select %p3868_p4, 1, 0 }
  0xb7   : > { %s4904_s27 = scalar_select %p3864_p9, 1, 0 }
  0xb8   : > { %4906 = sst [smem:[#allocation41_spill]] %s4905_s24  ;;  %p2991_p11 = scmp.lt.s32.totalorder %s3578_s16, 2 }
  0xb9   : > { %s3874_s14 = sand.u32 1, %s3574_s15   ;;  %p3876_p12 = por %p379_p10, %p61_p3 }
  0xba   : > { %s4856_s18 = sand.u32 1, %s3578_s16   ;;  %p3881_p0 = pnand %p2991_p11, %p57_p5 }
  0xbb   : > { %s4907_s22 = scalar_select %p3876_p12, 1, 0 }
  0xbc   : > { %s4909_s25 = scalar_select %p3881_p0, 1, 0 }
  0xbd   : > { %4908 = sst [smem:[#allocation42_spill]] %s4907_s22  ;;  %s4853_s12 = sshll.u32 %s3874_s14, 7 }
  0xbe   : > { %s4854_s0 = sshll.u32 %s3578_s16, 11  ;;  %s4910_s1 = sld [smem:[#allocation44_spill]] }
  0xbf   : > { %s548_s26 = scalar_lea.vmem [#allocation5], %s4853_s12  ;;  %s3900_s5 = scalar_lea.sflag [#allocation6], %s4856_s18 }
  0xc0   : > { %s555_s20 = sshll.u32 %s548_s26, 4  ;;  %p3906_p1 = pneg %p3881_p0  ;;  %s3896_s20 = int_to_ptr.vmem [resolvable:$true] %s555_s20 }
  0xc2   : > { %s4911_s9 = scalar_select %p3906_p1, 1, 0 }
  0xc4   : > { %s3892_s28 = scalar_lea.hbm %s4910_s1, %s4854_s0  ;;  %s3225_s26 = scalar_lea.hbm %s4910_s1, 4096 }
  0xc5   : > { %s3220_s7 = scalar_lea.hbm %s3892_s28, 2048  ;;  %p3226_p5 = scmp.lt.u32.totalorder %s3892_s28, %s4910_s1 }
  0xc6   : > { %p3221_p13 = scmp.ne.s32.totalorder %s3892_s28, %s3220_s7  ;;  %p3227_p7 = scmp.lt.u32.totalorder %s3225_s26, %s3220_s7 }
  0xc7   : > { %p3229_p11 = scmp.lt.u32.totalorder %s3220_s7, %s3892_s28 }
  0xc8   : > { %p3223_p3 = pnand %p3906_p1, %p3221_p13  ;;  %p3228_p10 = por %p3227_p7, %p3226_p5 }
  0xca   : > { %p3224_p2 = pneg %p3223_p3  ;;  %p3230_p12 = por %p3229_p11, %p3228_p10 }
  0xcc   : > { %p3231_p4 = pnand %p3230_p12, %p3224_p2 }
  0xce   : > { %3234 = shalt.err (!%p3231_p4)
}
  0xcf   : > { %s3235_s18 = scalar_lea.vmem %s3896_s20, 2048  ;;  %s3587_s4 = smov [#allocation5]  }
  0xd0   : > { %p3236_p13 = scmp.ne.s32.totalorder %s3896_s20, %s3235_s18  ;;  %s3240_s2 = sshll.u32 %s3587_s4, 4  ;;  %s3241_s2 = int_to_ptr.vmem [resolvable:$false] %s3240_s2 }
  0xd1   : > { %s3242_s12 = scalar_lea.vmem %s3241_s2, 4096  ;;  %p3243_p6 = scmp.lt.s32.totalorder %s3896_s20, %s3241_s2 }
  0xd2   : > { %p3238_p3 = pnand %p3236_p13, %p3906_p1  ;;  %p3244_p8 = scmp.lt.s32.totalorder %s3242_s12, %s3235_s18 }
  0xd4   : > { %p3239_p9 = pneg %p3238_p3  ;;  %p3245_p5 = por %p3244_p8, %p3243_p6 }
  0xd6   : > { %p3246_p7 = pnand %p3245_p5, %p3239_p9 }
  0xd8   : > { %3249 = shalt.err (!%p3246_p7)
}
  0xd9   : > { %s4871_s7 = smov 128   ;;  %s4874_s0 = smov 8  }
  0xda   : > { %2970 = dma.hbm_to_vmem [thread:$0]  (!%p3881_p0), %s3892_s28, 2048, %s3896_s20, %s3900_s5, %s4871_s7, %s4871_s7, %s4874_s0  }
  0xdb   : > { %s4912_s26 = sshll.u32 %s3578_s16, 11  ;;  %s4913_s12 = sshll.u32 %s3874_s14, 7 }
  0xdc   : > { %s3938_s2 = scalar_lea.hbm %s4829_s3, %s4912_s26  ;;  %s3942_s1 = scalar_lea.vmem [#allocation8], %s4913_s12 }
  0xdd   : > { %s3590_s17 = smov [#allocation13]   ;;  %s4914_s6 = sld [smem:[#allocation48_spill]] }
  0xde   : > { %s425_s15 = sshll.u32 %s3590_s17, 4  ;;  %p4915_p8 = scmp.ne.s32.totalorder %s4896_s21, 0  ;;  %s426_s15 = int_to_ptr.vmem [resolvable:$true] %s425_s15 }
  0xe3   : > { %s3250_s29 = scalar_lea.hbm %s4914_s6, 16 }
  0xe4   : > { %p3251_p6 = scmp.ne.s32.totalorder %s4914_s6, %s3250_s29  ;;  %p3257_p12 = scmp.lt.u32.totalorder %s3250_s29, %s4914_s6 }
  0xe6   : > { %p3253_p9 = pnand %p3251_p6, %p4915_p8 }
  0xe8   : > { %p3254_p4 = pneg %p3253_p9 }
  0xea   : > { %p3259_p2 = pnand %p3257_p12, %p3254_p4 }
  0xec   : > { %3262 = shalt.err (!%p3259_p2)
}
  0xed   : > { %s3263_s4 = scalar_lea.vmem %s426_s15, 16  ;;  %s3270_s13 = scalar_lea.vmem %s426_s15, 32 }
  0xee   : > { %p3264_p10 = scmp.ne.s32.totalorder %s426_s15, %s3263_s4  ;;  %p3271_p3 = scmp.lt.s32.totalorder %s426_s15, %s426_s15 }
  0xef   : > { %p3272_p5 = scmp.lt.s32.totalorder %s3270_s13, %s3263_s4 }
  0xf0   : > { %p3266_p11 = pnand %p3264_p10, %p4915_p8 }
  0xf1   : > { %p3273_p7 = por %p3272_p5, %p3271_p3 }
  0xf2   : > { %p3267_p13 = pneg %p3266_p11 }
  0xf4   : > { %p3274_p0 = pnand %p3273_p7, %p3267_p13 }
  0xf6   : > { %3277 = shalt.err (!%p3274_p0)
}
  0xf7   : > { %p4916_p6 = scmp.ne.s32.totalorder %s4894_s23, 0  ;;  %s3591_s29 = smov [#allocation16]  }
  0xf8   : > { %s448_s22 = sshll.u32 %s3591_s29, 4  ;;  %s3592_s18 = smov [#allocation19]   ;;  %s449_s22 = int_to_ptr.vmem [resolvable:$true] %s448_s22 }
  0xf9   : > { %2942 = dma.hbm_to_vmem [thread:$0]  (!%p4916_p6), %s4914_s6, 16, %s426_s15, [#allocation12]  }
  0xfa   : > { %s472_s12 = sshll.u32 %s3592_s18, 4  ;;  %s4917_s8 = sld [smem:[#allocation50_spill]]  ;;  %s473_s12 = int_to_ptr.vmem [resolvable:$true] %s472_s12 }
 0x100   : > { %s3278_s26 = scalar_lea.hbm %s4917_s8, 256 }
 0x101   : > { %p3279_p0 = scmp.ne.s32.totalorder %s4917_s8, %s3278_s26  ;;  %p3285_p12 = scmp.lt.u32.totalorder %s3278_s26, %s4917_s8 }
 0x103   : > { %p3281_p9 = pnand %p3279_p0, %p4915_p8 }
 0x105   : > { %p3282_p4 = pneg %p3281_p9 }
 0x107   : > { %p3287_p2 = pnand %p3285_p12, %p3282_p4 }
 0x109   : > { %3290 = shalt.err (!%p3287_p2)
}
 0x10a   : > { %s3291_s15 = scalar_lea.vmem %s449_s22, 256  ;;  %p3299_p3 = scmp.lt.s32.totalorder %s449_s22, %s449_s22 }
 0x10b   : > { %p3292_p10 = scmp.ne.s32.totalorder %s449_s22, %s3291_s15  ;;  %p3300_p5 = scmp.lt.s32.totalorder %s3291_s15, %s3291_s15 }
 0x10d   : > { %p3294_p11 = pnand %p3292_p10, %p4915_p8  ;;  %p3301_p7 = por %p3300_p5, %p3299_p3 }
 0x10f   : > { %p3295_p13 = pneg %p3294_p11 }
 0x111   : > { %p3302_p1 = pnand %p3301_p7, %p3295_p13 }
 0x113   : > { %3305 = shalt.err (!%p3302_p1)
}
 0x114   : > { %s4918_s24 = smov 4   ;;  %s4919_s29 = smov 64  }
 0x115   : > { %2948 = dma.hbm_to_vmem [thread:$0]  (!%p4916_p6), %s4917_s8, 256, %s449_s22, [#allocation15], %s4919_s29, %s4919_s29, %s4918_s24  }
 0x116   : > { %s3306_s26 = scalar_lea.hbm %s4836_s10, 128 }
 0x117   : > { %p3307_p0 = scmp.ne.s32.totalorder %s4836_s10, %s3306_s26  ;;  %p3313_p4 = scmp.lt.u32.totalorder %s3306_s26, %s4836_s10 }
 0x119   : > { %p3309_p1 = pnand %p3307_p0, %p4915_p8 }
 0x11b   : > { %p3310_p9 = pneg %p3309_p1 }
 0x11d   : > { %p3315_p12 = pnand %p3313_p4, %p3310_p9 }
 0x11f   : > { %3318 = shalt.err (!%p3315_p12)
}
 0x120   : > { %s3319_s7 = scalar_lea.vmem %s473_s12, 128  ;;  %p3327_p13 = scmp.lt.s32.totalorder %s473_s12, %s473_s12 }
 0x121   : > { %p3320_p2 = scmp.ne.s32.totalorder %s473_s12, %s3319_s7  ;;  %p3328_p3 = scmp.lt.s32.totalorder %s3319_s7, %s3319_s7 }
 0x123   : > { %p3322_p10 = pnand %p3320_p2, %p4915_p8  ;;  %p3329_p5 = por %p3328_p3, %p3327_p13 }
 0x125   : > { %p3323_p11 = pneg %p3322_p10 }
 0x127   : > { %p3330_p7 = pnand %p3329_p5, %p3323_p11 }
 0x129   : > { %3333 = shalt.err (!%p3330_p7)
}
 0x12a   : > { %2954 = dma.hbm_to_vmem [thread:$0]  (!%p4916_p6), %s4836_s10, 128, %s473_s12, [#allocation18], %s4919_s29, %s4919_s29, %s4918_s24  }
 0x12b   : > { %s3593_s20 = smov [#allocation22]   ;;  %s3594_s26 = smov [#allocation23]  }
 0x12c   : > { %s498_s28 = sshll.u32 %s3593_s20, 4  ;;  %s512_s4 = sshll.u32 %s3594_s26, 4  ;;  %s499_s28 = int_to_ptr.vmem [resolvable:$true] %s498_s28  ;;  %s513_s4 = int_to_ptr.vmem [resolvable:$true] %s512_s4 }
 0x12d   : > { %s4920_s15 = sld [smem:[#allocation53_spill]] }
 0x133   : > { %s4921_s7 = smov %s4920_s15  ;;  %s3334_s0 = scalar_lea.hbm %s4920_s15, 128 }
 0x134   : > { %p3335_p0 = scmp.ne.s32.totalorder %s4921_s7, %s3334_s0  ;;  %p3341_p4 = scmp.lt.u32.totalorder %s3334_s0, %s4921_s7 }
 0x136   : > { %p3337_p1 = pnand %p3335_p0, %p4915_p8 }
 0x138   : > { %p3338_p9 = pneg %p3337_p1 }
 0x13a   : > { %p3343_p12 = pnand %p3341_p4, %p3338_p9 }
 0x13c   : > { %3346 = shalt.err (!%p3343_p12)
}
 0x13d   : > { %s3347_s12 = scalar_lea.vmem %s499_s28, 128  ;;  %p3355_p13 = scmp.lt.s32.totalorder %s499_s28, %s499_s28 }
 0x13e   : > { %p3348_p2 = scmp.ne.s32.totalorder %s499_s28, %s3347_s12  ;;  %p3356_p3 = scmp.lt.s32.totalorder %s3347_s12, %s3347_s12 }
 0x140   : > { %p3350_p10 = pnand %p3348_p2, %p4915_p8  ;;  %p3357_p5 = por %p3356_p3, %p3355_p13 }
 0x142   : > { %p3351_p11 = pneg %p3350_p10 }
 0x144   : > { %p3358_p7 = pnand %p3357_p5, %p3351_p11 }
 0x146   : > { %3361 = shalt.err (!%p3358_p7)
}
 0x147   : > { %2960 = dma.hbm_to_vmem [thread:$0]  (!%p4916_p6), %s4921_s7, 128, %s499_s28, [#allocation21], %s4919_s29, %s4919_s29, %s4918_s24  }
 0x148   : > { %s4922_s18 = sld [smem:[#allocation54_spill]] }
 0x14e   : > { %s3362_s20 = scalar_lea.hbm %s4922_s18, 16 }
 0x14f   : > { %p3363_p0 = scmp.ne.s32.totalorder %s4922_s18, %s3362_s20  ;;  %p3369_p4 = scmp.lt.u32.totalorder %s3362_s20, %s4922_s18 }
 0x151   : > { %p3365_p1 = pnand %p3363_p0, %p4915_p8 }
 0x153   : > { %p3366_p9 = pneg %p3365_p1 }
 0x155   : > { %p3371_p12 = pnand %p3369_p4, %p3366_p9 }
 0x157   : > { %3374 = shalt.err (!%p3371_p12)
}
 0x158   : > { %s3375_s22 = scalar_lea.vmem %s513_s4, 16  ;;  %s3382_s28 = scalar_lea.vmem %s513_s4, 32 }
 0x159   : > { %p3376_p2 = scmp.ne.s32.totalorder %s513_s4, %s3375_s22  ;;  %p3383_p13 = scmp.lt.s32.totalorder %s513_s4, %s513_s4 }
 0x15a   : > { %p3384_p3 = scmp.lt.s32.totalorder %s3382_s28, %s3375_s22 }
 0x15b   : > { %p3378_p10 = pnand %p3376_p2, %p4915_p8 }
 0x15c   : > { %p3385_p5 = por %p3384_p3, %p3383_p13 }
 0x15d   : > { %p3379_p11 = pneg %p3378_p10 }
 0x15f   : > { %p3386_p7 = pnand %p3385_p5, %p3379_p11 }
 0x161   : > { %3389 = shalt.err (!%p3386_p7)
}
 0x162   : > { %2963 = dma.hbm_to_vmem [thread:$0]  (!%p4916_p6), %s4922_s18, 16, %s513_s4, [#allocation24]  }
 0x163   : > { %s4876_s21 = sshll.u32 %s3874_s14, 6  ;;  %s2657_s8 = sshll.u32 %s3578_s16, 10 }
 0x164   : > { %s4923_s20 = sld [smem:[#allocation43_spill]]  ;;  %s527_s23 = scalar_lea.vmem [#allocation2], %s4876_s21 }
 0x165   : > { %s534_s13 = sshll.u32 %s527_s23, 4  ;;  %s4924_s22 = sld [smem:[#allocation45_spill]]  ;;  %s4053_s13 = int_to_ptr.vmem [resolvable:$true] %s534_s13 }
 0x166   : > { %s524_s28 = scalar_lea.sflag [#allocation3], %s3874_s14  ;;  %p4925_p6 = scmp.ne.s32.totalorder %s4911_s9, 0 }
 0x16a   : > { %s4049_s26 = scalar_lea.hbm %s4923_s20, %s2657_s8  ;;  %s3395_s0 = scalar_lea.hbm %s4923_s20, 2048 }
 0x16b   : > { %s4058_s4 = scalar_lea.hbm %s4924_s22, %s2657_s8  ;;  %s3390_s12 = scalar_lea.hbm %s4049_s26, 1024 }
 0x16c   : > { %p3391_p8 = scmp.ne.s32.totalorder %s4049_s26, %s3390_s12  ;;  %p3396_p9 = scmp.lt.u32.totalorder %s4049_s26, %s4923_s20 }
 0x16d   : > { %p3397_p4 = scmp.lt.u32.totalorder %s3395_s0, %s3390_s12  ;;  %p3399_p2 = scmp.lt.u32.totalorder %s3390_s12, %s4049_s26 }
 0x16e   : > { %p3393_p0 = pnand %p3391_p8, %p4925_p6 }
 0x16f   : > { %p3398_p12 = por %p3397_p4, %p3396_p9 }
 0x170   : > { %p3394_p1 = pneg %p3393_p0 }
 0x171   : > { %p3400_p10 = por %p3399_p2, %p3398_p12 }
 0x173   : > { %p3401_p11 = pnand %p3400_p10, %p3394_p1 }
 0x175   : > { %3404 = shalt.err (!%p3401_p11)
}
 0x176   : > { %s3405_s8 = scalar_lea.vmem %s4053_s13, 1024  ;;  %s3595_s23 = smov [#allocation2]  }
 0x177   : > { %p3406_p13 = scmp.ne.s32.totalorder %s4053_s13, %s3405_s8  ;;  %s3410_s17 = sshll.u32 %s3595_s23, 4  ;;  %s3411_s17 = int_to_ptr.vmem [resolvable:$false] %s3410_s17 }
 0x178   : > { %s3412_s7 = scalar_lea.vmem %s3411_s17, 2048  ;;  %p3413_p7 = scmp.lt.s32.totalorder %s4053_s13, %s3411_s17 }
 0x179   : > { %p3408_p3 = pnand %p3406_p13, %p4925_p6  ;;  %p3414_p8 = scmp.lt.s32.totalorder %s3412_s7, %s3405_s8 }
 0x17b   : > { %p3409_p5 = pneg %p3408_p3  ;;  %p3415_p0 = por %p3414_p8, %p3413_p7 }
 0x17d   : > { %p3416_p9 = pnand %p3415_p0, %p3409_p5 }
 0x17f   : > { %3419 = shalt.err (!%p3416_p9)
}
 0x180   : > { %p4926_p1 = scmp.ne.s32.totalorder %s4909_s25, 0  ;;  %s4927_s21 = sshll.u32 %s3942_s1, 4  ;;  %s4089_s21 = int_to_ptr.vmem [resolvable:$true] %s4927_s21 }
 0x181   : > { %s4928_s15 = sshll.u32 %s3874_s14, 6  ;;  %s3420_s11 = scalar_lea.hbm %s4058_s4, 1024 }
 0x182   : > { %2967 = dma.hbm_to_vmem [thread:$0]  (!%p4926_p1), %s4049_s26, 1024, %s4053_s13, %s524_s28, %s4919_s29, %s4919_s29, %s4918_s24  }
 0x183   : > { %s569_s12 = scalar_lea.vmem [#allocation7], %s4928_s15  ;;  %p3421_p4 = scmp.ne.s32.totalorder %s4058_s4, %s3420_s11 }
 0x184   : > { %s576_s6 = sshll.u32 %s569_s12, 4  ;;  %s3425_s23 = scalar_lea.hbm %s4924_s22, 2048  ;;  %s4093_s6 = int_to_ptr.vmem [resolvable:$true] %s576_s6 }
 0x185   : > { %p3423_p12 = pnand %p3421_p4, %p4925_p6  ;;  %p3426_p10 = scmp.lt.u32.totalorder %s4058_s4, %s4924_s22 }
 0x186   : > { %p3427_p11 = scmp.lt.u32.totalorder %s3425_s23, %s3420_s11  ;;  %p3429_p3 = scmp.lt.u32.totalorder %s3420_s11, %s4058_s4 }
 0x187   : > { %p3424_p2 = pneg %p3423_p12 }
 0x188   : > { %p3428_p13 = por %p3427_p11, %p3426_p10 }
 0x18a   : > { %p3430_p5 = por %p3429_p3, %p3428_p13 }
 0x18c   : > { %p3431_p7 = pnand %p3430_p5, %p3424_p2 }
 0x18e   : > { %3434 = shalt.err (!%p3431_p7)
}
 0x18f   : > { %s3435_s1 = scalar_lea.vmem %s4093_s6, 1024  ;;  %s3596_s14 = smov [#allocation7]  }
 0x190   : > { %p3436_p8 = scmp.ne.s32.totalorder %s4093_s6, %s3435_s1  ;;  %s3440_s26 = sshll.u32 %s3596_s14, 4  ;;  %s3441_s26 = int_to_ptr.vmem [resolvable:$false] %s3440_s26 }
 0x191   : > { %s3442_s13 = scalar_lea.vmem %s3441_s26, 2048  ;;  %p3443_p4 = scmp.lt.s32.totalorder %s4093_s6, %s3441_s26 }
 0x192   : > { %p3438_p0 = pnand %p3436_p8, %p4925_p6  ;;  %p3444_p12 = scmp.lt.s32.totalorder %s3442_s13, %s3435_s1 }
 0x194   : > { %p3439_p9 = pneg %p3438_p0  ;;  %p3445_p10 = por %p3444_p12, %p3443_p4 }
 0x196   : > { %p3446_p11 = pnand %p3445_p10, %p3439_p9 }
 0x198   : > { %3449 = shalt.err (!%p3446_p11)
}
 0x199   : > { %2973 = dma.hbm_to_vmem [thread:$0]  (!%p4926_p1), %s4058_s4, 1024, %s4093_s6, %s3900_s5, %s4919_s29, %s4919_s29, %s4918_s24  }
 0x19a   : > { %s4929_s28 = sand.u32 1, %s3578_s16   ;;  %s3450_s12 = scalar_lea.hbm %s3938_s2, 2048 }
 0x19b   : > { %s4122_s15 = scalar_lea.sflag [#allocation9], %s4929_s28  ;;  %p3451_p2 = scmp.ne.s32.totalorder %s3938_s2, %s3450_s12 }
 0x19c   : > { %s3455_s8 = scalar_lea.hbm %s4829_s3, 4096  ;;  %p3456_p5 = scmp.lt.u32.totalorder %s3938_s2, %s4829_s3 }
 0x19d   : > { %p3453_p13 = pnand %p3451_p2, %p4925_p6  ;;  %p3457_p7 = scmp.lt.u32.totalorder %s3455_s8, %s3450_s12 }
 0x19e   : > { %p3459_p0 = scmp.lt.u32.totalorder %s3450_s12, %s3938_s2 }
 0x19f   : > { %p3454_p3 = pneg %p3453_p13  ;;  %p3458_p8 = por %p3457_p7, %p3456_p5 }
 0x1a1   : > { %p3460_p9 = por %p3459_p0, %p3458_p8 }
 0x1a3   : > { %p3461_p4 = pnand %p3460_p9, %p3454_p3 }
 0x1a5   : > { %3464 = shalt.err (!%p3461_p4)
}
 0x1a6   : > { %s3465_s5 = scalar_lea.vmem %s4089_s21, 2048  ;;  %s3597_s24 = smov [#allocation8]  }
 0x1a7   : > { %p3466_p12 = scmp.ne.s32.totalorder %s4089_s21, %s3465_s5  ;;  %s3470_s29 = sshll.u32 %s3597_s24, 4  ;;  %s3471_s29 = int_to_ptr.vmem [resolvable:$false] %s3470_s29 }
 0x1a8   : > { %s3472_s4 = scalar_lea.vmem %s3471_s29, 4096  ;;  %p3473_p2 = scmp.lt.s32.totalorder %s4089_s21, %s3471_s29 }
 0x1a9   : > { %p3468_p10 = pnand %p3466_p12, %p4925_p6  ;;  %p3474_p13 = scmp.lt.s32.totalorder %s3472_s4, %s3465_s5 }
 0x1ab   : > { %p3469_p11 = pneg %p3468_p10  ;;  %p3475_p5 = por %p3474_p13, %p3473_p2 }
 0x1ad   : > { %p3476_p7 = pnand %p3475_p5, %p3469_p11 }
 0x1af   : > { %3479 = shalt.err (!%p3476_p7)
}
 0x1b0   : > { %s4930_s6 = smov 8   ;;  %s4931_s7 = smov 128  }
 0x1b1   : > { %2976 = dma.hbm_to_vmem [thread:$0]  (!%p4926_p1), %s3938_s2, 2048, %s4089_s21, %s4122_s15, %s4931_s7, %s4931_s7, %s4930_s6  }
 0x1b2   : > { %s4932_s9 = sld [smem:[#allocation38_spill]] }
 0x1b8   : > { %p4933_p6 = scmp.ne.s32.totalorder %s4932_s9, 0 }
 0x1b9   : > { %s4152_s1 = sand.u32 (!%p4933_p6), 1, %s3570_s30   ;;  %p4934_p3 = scmp.ne.s32.totalorder (!%p4933_p6), %s4904_s27, 0 }
 0x1ba   : > { %609 = sbr.rel (%p4933_p6) target bundleno = 1703 (0x6a7), region = 76  ;;  %s2551_s14 = sshll.u32 (!%p4933_p6), %s4152_s1, 6 }
 0x1bb   : > { %s612_s26 = scalar_lea.sflag (!%p4933_p6), [#allocation3], %s4152_s1  ;;  %s4156_s13 = scalar_lea.vmem (!%p4933_p6), [#allocation2], %s2551_s14 }
 0x1c1   : > { %3525 = dma.done.wait (%p4934_p3), %s612_s26, 1024  }
 0x1c2   : > { %3527 = vsyncadd (%p4934_p3), %s612_s26, 4294966272  ;;  %s620_s25 = sand.u32 1, %s3699_s19   ;;  %s4164_s2 = sshll.u32 %s4152_s1, 7 }
 0x1c3   : > { %s621_s21 = scalar_lea.sflag [#allocation6], %s620_s25  ;;  %s4167_s28 = scalar_lea.vmem [#allocation5], %s4164_s2 }
 0x1c4   : > { %3529 = dma.done.wait (%p4934_p3), %s621_s21, 3072  }
 0x1c5   : > { %3531 = vsyncadd (%p4934_p3), %s621_s21, 4294964224  ;;  %s4173_s15 = scalar_lea.vmem [#allocation7], %s2551_s14  ;;  %s639_s12 = scalar_lea.sflag [#allocation9], %s620_s25 }
 0x1c6   : > { %s4176_s11 = scalar_lea.vmem [#allocation8], %s4164_s2 }
 0x1c7   : > { %3533 = dma.done.wait (%p4934_p3), %s639_s12, 2048  }
 0x1c8   : > { %3535 = vsyncadd (%p4934_p3), %s639_s12, 4294965248  ;;  %p4935_p1 = scmp.eq.s32.totalorder %s3699_s19, 0 }
 0x1ca   : > { %3537 = dma.done.wait (%p4935_p1), [#allocation9], 256   ;;  %p4936_p8 = pmov %p4935_p1 }
 0x1cb   : > { %p4937_p0 = pmov %p4935_p1 }
 0x1cc   : > { %3539 = vsyncadd (%p4936_p8), [#allocation9], 4294967040 }
 0x1cd   : > { %3541 = dma.done.wait (%p4937_p0), [#allocation12], 272   ;;  %p4938_p9 = pmov %p4937_p0 }
 0x1ce   : > { %p4939_p4 = pmov %p4937_p0 }
 0x1cf   : > { %3543 = vsyncadd (%p4938_p9), [#allocation12], 4294967024 }
 0x1d0   : > { %3545 = dma.done.wait (%p4939_p4), [#allocation15], 512   ;;  %p4940_p12 = pmov %p4937_p0 }
 0x1d1   : > { %p4941_p10 = pmov %p4937_p0 }
 0x1d2   : > { %3547 = vsyncadd (%p4940_p12), [#allocation15], 4294966784 }
 0x1d3   : > { %3549 = dma.done.wait (%p4941_p10), [#allocation18], 144   ;;  %p4942_p11 = pmov %p4937_p0 }
 0x1d4   : > { %p4943_p2 = pmov %p4937_p0 }
 0x1d5   : > { %3551 = vsyncadd (%p4942_p11), [#allocation18], 4294967152 }
 0x1d6   : > { %3553 = dma.done.wait (%p4943_p2), [#allocation21], 256   ;;  %p4944_p13 = pmov %p4937_p0 }
 0x1d7   : > { %p4945_p5 = pmov %p4937_p0 }
 0x1d8   : > { %3555 = vsyncadd (%p4944_p13), [#allocation21], 4294967040 }
 0x1d9   : > { %3557 = dma.done.wait (%p4945_p5), [#allocation24], 16   ;;  %p4946_p7 = pmov %p4937_p0 }
 0x1da   : > { %v3053_v0 = vld [vmem:[#allocation10] sm:$0xff]   ;;  %v3054_v1 = vld [vmem:[#allocation10 + $0x8] sm:$0xff]   ;;  %vm831_vm0 = vcmask 261120   ;;  %v3057_v4 = vld [vmem:[%s4156_s13 + $0x10] sm:$0xff]   ;;  %vm1554_vm1 = vcmask 130048   ;;  %s3598_s27 = smov 16  }
 0x1db   : > { %3559 = vsyncadd (%p4946_p7), [#allocation24], 4294967280  ;;  %2729 = vmatprep.subr.bf16.mxu0 %v3053_v0  ;;  %v3055_v2 = vld [vmem:[%s4156_s13] sm:$0xff]   ;;  %v3056_v3 = vld [vmem:[%s4156_s13 + $0x8] sm:$0xff]   ;;  %s3599_s0 = smov 112   ;;  %s4670_s8 = scalar_lea.vmem [#allocation25], %s4164_s2 }
 0x1dc   : > { %2730 = vmatpush3.bf16.msra.mxu0 %v3053_v0  ;;  %2733 = vmatprep.mubr.msk.bf16.mxu0 %vm831_vm0, %v3055_v2  ;;  %v3063_v5 = vld [vmem:[#allocation11] sm:$0xff]   ;;  %v3064_v6 = vld [vmem:[#allocation11 + $0x8] sm:$0xff]   ;;  %v3059_v8 = vld [vmem:[%s4156_s13 + $0x20] sm:$0xff]   ;;  %s4947_s23 = sld [smem:[#allocation41_spill]]  ;;  %s2661_s17 = sshll.u32 %s3699_s19, 11 }
 0x1dd   : > { %2731 = vmatprep.subr.bf16.mxu0 %v3054_v1  ;;  %v3058_v7 = vld [vmem:[%s4156_s13 + $0x18] sm:$0xff]   ;;  %2863 = vmatprep.subr.bf16.mxu1 %v3063_v5  ;;  %v3060_v9 = vld [vmem:[%s4156_s13 + $0x28] sm:$0xff]   ;;  %v3061_v10 = vld [vmem:[%s4156_s13 + $0x30] sm:$0xff]   ;;  %s2291_s5 = sshll.u32 %s4670_s8, 4  ;;  %s4948_s4 = sld [smem:[#allocation55_spill]]  ;;  %s4780_s5 = int_to_ptr.vmem [resolvable:$true] %s2291_s5 }
 0x1de   : > { %2865 = vmatpush3.bf16.msra.mxu1 %v3063_v5  ;;  %v3062_v11 = vld [vmem:[%s4156_s13 + $0x38] sm:$0xff]   ;;  %v3065_v12 = vld [vmem:[#allocation14] sm:$0xff]   ;;  %v761_v13 = vld [vmem:[%s4167_s28 + $0x10] sm:$0xff]  ;;  %s2278_s19 = scalar_lea.sflag [#allocation4], %s4152_s1  ;;  %s3480_s7 = scalar_lea.vmem %s4780_s5, 2048 }
 0x1df   : > { %2864 = vmatprep.subr.bf16.mxu1 %v3064_v6  ;;  %v759_v14 = vld [vmem:[%s4167_s28] sm:$0xff]  ;;  %v762_v16 = vld [vmem:[%s4167_s28 + $0x18] sm:$0xff]  ;;  %v760_v19 = vld [vmem:[%s4167_s28 + $0x8] sm:$0xff]  ;;  %p3481_p6 = scmp.ne.s32.totalorder %s4780_s5, %s3480_s7  ;;  %s3600_s9 = smov [#allocation25]  }
 0x1e0   : > { %2732 = vmatpush3.bf16.msra.mxu0 %v3054_v1  ;;  %v765_v29 = vld [vmem:[%s4167_s28 + $0x30] sm:$0xff]  ;;  %v763_v31 = vld [vmem:[%s4167_s28 + $0x20] sm:$0xff]  ;;  %v766_v34 = vld [vmem:[%s4167_s28 + $0x38] sm:$0xff]  ;;  %s3484_s14 = sshll.u32 %s3600_s9, 4  ;;  %s3485_s14 = int_to_ptr.vmem [resolvable:$false] %s3484_s14 }
 0x1e1   : > { %2749 = vmatprep.subr.bf16.mxu0 %v3063_v5  ;;  %v764_v37 = vld [vmem:[%s4167_s28 + $0x28] sm:$0xff]  ;;  %v769_v48 = vld [vmem:[%s4167_s28 + $0x50] sm:$0xff]  ;;  %v767_v50 = vld [vmem:[%s4167_s28 + $0x40] sm:$0xff]  ;;  %s3486_s26 = scalar_lea.vmem %s3485_s14, 4096  ;;  %p3487_p0 = scmp.lt.s32.totalorder %s4780_s5, %s3485_s14 }
 0x1e2   : > { %2866 = vmatpush3.bf16.msra.mxu1 %v3064_v6  ;;  %v3066_v38 = vld [vmem:[#allocation14 + $0x8] sm:$0xff]   ;;  %v3067_v52 = vld [vmem:[%s4173_s15] sm:$0xff]   ;;  %v770_v54 = vld [vmem:[%s4167_s28 + $0x58] sm:$0xff]  ;;  %p4949_p3 = scmp.ne.s32.totalorder %s4947_s23, 0  ;;  %p3488_p9 = scmp.lt.s32.totalorder %s3486_s26, %s3480_s7 }
 0x1e3   : > { %2734 = vmatmul.mubr.msk.bf16.vlgmr.msra.gmra.mrb[0].mxu0 %vm831_vm0, %v3056_v3  ;;  %v768_v57 = vld [vmem:[%s4167_s28 + $0x48] sm:$0xff]  ;;  %v773_v3 = vld [vmem:[%s4167_s28 + $0x70] sm:$0xff]  ;;  %s4778_s6 = scalar_lea.hbm %s4948_s4, %s2661_s17 }
 0x1e4   : > { %2737 = vmatprep.mubr.msk.bf16.mxu0 %vm831_vm0, %v3057_v4  ;;  %2750 = vmatpush3.bf16.msra.mxu0 %v3063_v5  ;;  %v3068_v4 = vld [vmem:[%s4173_s15 + $0x8] sm:$0xff]   ;;  %p3482_p1 = pnand %p3481_p6, %p4949_p3  ;;  %p3489_p4 = por %p3488_p9, %p3487_p0 }
 0x1e5   : > { %2751 = vmatprep.subr.bf16.mxu0 %v3064_v6 }
 0x1e6   : > { %p3483_p8 = pneg %p3482_p1 }
 0x1e8   : > { %2752 = vmatpush3.bf16.msra.mxu0 %v3064_v6  ;;  %v771_v6 = vld [vmem:[%s4167_s28 + $0x60] sm:$0xff]  ;;  %p3490_p12 = pnand %p3489_p4, %p3483_p8 }
 0x1e9   : > { %2769 = vmatprep.subr.bf16.mxu0 %v3065_v12 }
 0x1eb   : > { %2738 = vmatmul.mubr.msk.bf16.gmra.mrb[4].mxu0 %vm831_vm0, %v3058_v7  ;;  %v3069_v7 = vld [vmem:[%s4173_s15 + $0x10] sm:$0xff]  }
 0x1ec   : > { %2741 = vmatprep.mubr.msk.bf16.mxu0 %vm831_vm0, %v3059_v8 }
 0x1f3   : > { %2742 = vmatmul.mubr.msk.bf16.gmra.mrb[8].mxu0 %vm831_vm0, %v3060_v9  ;;  %v774_v9 = vld [vmem:[%s4167_s28 + $0x78] sm:$0xff] }
 0x1f4   : > { %2745 = vmatprep.mubr.msk.bf16.mxu0 %vm831_vm0, %v3061_v10 }
 0x1fb   : > { %2746 = vmatmul.mubr.msk.bf16.gmra.mrb[12].mxu0 %vm831_vm0, %v3062_v11 }
 0x2b6   : > { %v2735_v15 = vpop.f32.mrb[0].mxu0 }
 0x2b7   : > { %v899_v17 = vadd.f32 %v2735_v15, %v761_v13  ;;  %v890_v18 = vpop.f32.mrb[1].mxu0  ;;  %v772_v13 = vld [vmem:[%s4167_s28 + $0x68] sm:$0xff] }
 0x2b8   : > { %v891_v20 = vadd.f32 %v890_v18, %v759_v14  ;;  %v2736_v21 = vpop.f32.mrb[2].mxu0 }
 0x2b9   : > { %v902_v22 = vadd.f32 %v2736_v21, %v762_v16  ;;  %v893_v23 = vpop.f32.mrb[3].mxu0  ;;  %v955_v25 = vmax.f32 %v899_v17, 0.0 }
 0x2ba   : > { %v894_v24 = vadd.f32 %v893_v23, %v760_v19  ;;  %v953_v27 = vmax.f32 %v891_v20, 0.0  ;;  %v3070_v23 = vld [vmem:[%s4173_s15 + $0x18] sm:$0xff]  }
 0x2bb   : > { %v956_v26 = vmax.f32 %v902_v22, 0.0 }
 0x2bc   : > { %v954_v28 = vmax.f32 %v894_v24, 0.0 }
 0x2bd   : > { %v970_v30 = vpack.c.bf16 %v956_v26, %v955_v25  ;;  %v3071_v25 = vld [vmem:[%s4173_s15 + $0x20] sm:$0xff]  }
 0x2be   : > { %v969_v32 = vpack.c.bf16 %v954_v28, %v953_v27  ;;  %v2739_v33 = vpop.f32.mrb[4].mxu0  ;;  %v3072_v27 = vld [vmem:[%s4173_s15 + $0x28] sm:$0xff]   ;;  %v3073_v28 = vld [vmem:[%s4173_s15 + $0x30] sm:$0xff]  }
 0x2bf   : > { %v915_v35 = vadd.f32 %v2739_v33, %v765_v29  ;;  %v906_v36 = vpop.f32.mrb[5].mxu0  ;;  %v3074_v29 = vld [vmem:[%s4173_s15 + $0x38] sm:$0xff]   ;;  %v4262_v33 = vld [vmem:[#allocation13] ss:$0 sm:$0xff] }
 0x2c0   : > { %v907_v39 = vadd.f32 %v906_v36, %v763_v31  ;;  %v2740_v40 = vpop.f32.mrb[6].mxu0  ;;  %2753 = vmatprep.mubr.msk.bf16.mxu0 %vm831_vm0, %v969_v32  ;;  %v3076_v31 = vld [vmem:[#allocation16] sm:$0xff]   ;;  %v3077_v32 = vld [vmem:[#allocation16 + $0x8] sm:$0xff]  }
 0x2c1   : > { %v918_v41 = vadd.f32 %v2740_v40, %v766_v34  ;;  %v909_v42 = vpop.f32.mrb[7].mxu0  ;;  %2754 = vmatmul.mubr.msk.bf16.vlgmr.msra.gmra.mrb[16].mxu0 %vm831_vm0, %v970_v30  ;;  %v959_v44 = vmax.f32 %v915_v35, 0.0  ;;  %v3075_v30 = vld [vmem:[#allocation19] sm:$0xff]   ;;  %2789 = vmatprep.subr.bf16.mxu1 %v3076_v31 }
 0x2c2   : > { %v910_v43 = vadd.f32 %v909_v42, %v764_v37  ;;  %2770 = vmatpush3.bf16.msra.mxu0 %v3065_v12  ;;  %v957_v46 = vmax.f32 %v907_v39, 0.0 }
 0x2c3   : > { %v960_v45 = vmax.f32 %v918_v41, 0.0  ;;  %2771 = vmatprep.subr.bf16.mxu0 %v3066_v38 }
 0x2c4   : > { %v958_v47 = vmax.f32 %v910_v43, 0.0 }
 0x2c5   : > { %v972_v49 = vpack.c.bf16 %v960_v45, %v959_v44 }
 0x2c6   : > { %v971_v51 = vpack.c.bf16 %v958_v47, %v957_v46  ;;  %2772 = vmatpush3.bf16.msra.mxu0 %v3066_v38  ;;  %v2743_v53 = vpop.f32.mrb[8].mxu0 }
 0x2c7   : > { %v931_v55 = vadd.f32 %v2743_v53, %v769_v48  ;;  %v922_v56 = vpop.f32.mrb[9].mxu0  ;;  %2809 = vmatprep.subr.bf16.mxu0 %v3075_v30 }
 0x2c8   : > { %2757 = vmatprep.mubr.msk.bf16.mxu0 %vm831_vm0, %v971_v51  ;;  %v923_v58 = vadd.f32 %v922_v56, %v767_v50  ;;  %v2744_v59 = vpop.f32.mrb[10].mxu0 }
 0x2c9   : > { %2758 = vmatmul.mubr.msk.bf16.gmra.mrb[20].mxu0 %vm831_vm0, %v972_v49  ;;  %v963_v60 = vmax.f32 %v931_v55, 0.0  ;;  %v934_v61 = vadd.f32 %v2744_v59, %v770_v54  ;;  %v925_v62 = vpop.f32.mrb[11].mxu0 }
 0x2ca   : > { %2773 = vmatprep.mubr.msk.bf16.mxu0 %vm831_vm0, %v3067_v52  ;;  %v961_v63 = vmax.f32 %v923_v58, 0.0  ;;  %v926_v0 = vadd.f32 %v925_v62, %v768_v57  ;;  %v1153_v62 = vld [vmem:[%s4176_s11] sm:$0xff] }
 0x2cb   : > { %v964_v1 = vmax.f32 %v934_v61, 0.0 }
 0x2cc   : > { %v962_v2 = vmax.f32 %v926_v0, 0.0 }
 0x2cd   : > { %v974_v5 = vpack.c.bf16 %v964_v1, %v963_v60  ;;  %v1155_v60 = vld [vmem:[%s4176_s11 + $0x10] sm:$0xff]  ;;  %v1156_v1 = vld [vmem:[%s4176_s11 + $0x18] sm:$0xff] }
 0x2ce   : > { %v2747_v8 = vpop.f32.mrb[12].mxu0  ;;  %v973_v10 = vpack.c.bf16 %v962_v2, %v961_v63 }
 0x2cf   : > { %v947_v11 = vadd.f32 %v2747_v8, %v773_v3  ;;  %v938_v12 = vpop.f32.mrb[13].mxu0 }
 0x2d0   : > { %v939_v14 = vadd.f32 %v938_v12, %v771_v6  ;;  %v2748_v15 = vpop.f32.mrb[14].mxu0  ;;  %2761 = vmatprep.mubr.msk.bf16.mxu1 %vm831_vm0, %v973_v10 }
 0x2d1   : > { %2774 = vmatmul.mubr.msk.bf16.vlgmr.msra.gmra.mrb[24].mxu0 %vm831_vm0, %v3068_v4  ;;  %v967_v16 = vmax.f32 %v947_v11, 0.0  ;;  %v950_v17 = vadd.f32 %v2748_v15, %v774_v9  ;;  %v941_v18 = vpop.f32.mrb[15].mxu0  ;;  %2762 = vmatmul.mubr.msk.bf16.vlgmr.msra.gmra.mrb[0].mxu1 %vm831_vm0, %v974_v5  ;;  %v1154_v5 = vld [vmem:[%s4176_s11 + $0x8] sm:$0xff] }
 0x2d2   : > { %2777 = vmatprep.mubr.msk.bf16.mxu0 %vm831_vm0, %v3069_v7  ;;  %v965_v19 = vmax.f32 %v939_v14, 0.0  ;;  %v942_v20 = vadd.f32 %v941_v18, %v772_v13  ;;  %2810 = vmatpush3.bf16.msra.mxu0 %v3075_v30 }
 0x2d3   : > { %v968_v21 = vmax.f32 %v950_v17, 0.0  ;;  %2790 = vmatpush3.bf16.msra.mxu1 %v3076_v31 }
 0x2d4   : > { %v966_v22 = vmax.f32 %v942_v20, 0.0  ;;  %2791 = vmatprep.subr.bf16.mxu1 %v3077_v32 }
 0x2d5   : > { %v976_v24 = vpack.c.bf16 %v968_v21, %v967_v16 }
 0x2d6   : > { %v975_v26 = vpack.c.bf16 %v966_v22, %v965_v19 }
 0x2d7   : > { %2792 = vmatpush3.bf16.msra.mxu1 %v3077_v32  ;;  %v1160_v32 = vld [vmem:[%s4176_s11 + $0x38] sm:$0xff] }
 0x2d8   : > { %2765 = vmatprep.mubr.msk.bf16.mxu1 %vm831_vm0, %v975_v26 }
 0x2d9   : > { %2778 = vmatmul.mubr.msk.bf16.gmra.mrb[28].mxu0 %vm831_vm0, %v3070_v23  ;;  %2766 = vmatmul.mubr.msk.bf16.gmra.mrb[4].mxu1 %vm831_vm0, %v976_v24 }
 0x2da   : > { %2781 = vmatprep.mubr.msk.bf16.mxu0 %vm831_vm0, %v3071_v25  ;;  %v1159_v25 = vld [vmem:[%s4176_s11 + $0x30] sm:$0xff] }
 0x2e1   : > { %2782 = vmatmul.mubr.msk.bf16.gmra.mrb[32].mxu0 %vm831_vm0, %v3072_v27 }
 0x2e2   : > { %2785 = vmatprep.mubr.msk.bf16.mxu0 %vm831_vm0, %v3073_v28  ;;  %v1157_v28 = vld [vmem:[%s4176_s11 + $0x20] sm:$0xff] }
 0x2e9   : > { %2786 = vmatmul.mubr.msk.bf16.gmra.mrb[36].mxu0 %vm831_vm0, %v3074_v29 }
 0x394   : > { %v2755_v34 = vpop.f32.mrb[16].mxu0 }
 0x395   : > { %v1067_v35 = vadd.f32 %v2755_v34, %v4262_v33  ;;  %v1058_v36 = vpop.f32.mrb[17].mxu0 }
 0x396   : > { %v1059_v37 = vadd.f32 %v4262_v33, %v1058_v36  ;;  %v2756_v38 = vpop.f32.mrb[18].mxu0 }
 0x397   : > { %v1070_v39 = vadd.f32 %v2756_v38, %v4262_v33  ;;  %v1061_v40 = vpop.f32.mrb[19].mxu0  ;;  %v1123_v42 = vmax.f32 %v1067_v35, 0.0  ;;  %v1158_v38 = vld [vmem:[%s4176_s11 + $0x28] sm:$0xff] }
 0x398   : > { %v1062_v41 = vadd.f32 %v4262_v33, %v1061_v40  ;;  %v1121_v44 = vmax.f32 %v1059_v37, 0.0 }
 0x399   : > { %v1124_v43 = vmax.f32 %v1070_v39, 0.0 }
 0x39a   : > { %v1122_v45 = vmax.f32 %v1062_v41, 0.0 }
 0x39b   : > { %v4268_v46 = vpack.c.bf16 %v1124_v43, %v1123_v42 }
 0x39c   : > { %v4270_v47 = vpack.c.bf16 %v1122_v45, %v1121_v44  ;;  %v2759_v48 = vpop.f32.mrb[20].mxu0 }
 0x39d   : > { %v1083_v49 = vadd.f32 %v2759_v48, %v4262_v33  ;;  %v1074_v50 = vpop.f32.mrb[21].mxu0 }
 0x39e   : > { %v1075_v51 = vadd.f32 %v4262_v33, %v1074_v50  ;;  %v2760_v52 = vpop.f32.mrb[22].mxu0  ;;  %2811 = vmatprep.mubr.msk.bf16.mxu0 %vm1554_vm1, %v4270_v47 }
 0x39f   : > { %v1086_v53 = vadd.f32 %v2760_v52, %v4262_v33  ;;  %v1077_v54 = vpop.f32.mrb[23].mxu0  ;;  %2812 = vmatmul.mubr.msk.bf16.vlgmr.msra.gmra.mrb[40].mxu0 %vm1554_vm1, %v4268_v46  ;;  %v1127_v56 = vmax.f32 %v1083_v49, 0.0 }
 0x3a0   : > { %v1078_v55 = vadd.f32 %v4262_v33, %v1077_v54  ;;  %v1125_v58 = vmax.f32 %v1075_v51, 0.0 }
 0x3a1   : > { %v1128_v57 = vmax.f32 %v1086_v53, 0.0 }
 0x3a2   : > { %v1126_v59 = vmax.f32 %v1078_v55, 0.0 }
 0x3a3   : > { %v4281_v61 = vpack.c.bf16 %v1128_v57, %v1127_v56 }
 0x3a4   : > { %v4284_v63 = vpack.c.bf16 %v1126_v59, %v1125_v58  ;;  %v2775_v0 = vpop.f32.mrb[24].mxu0  ;;  %v2763_v2 = vpop.f32.mrb[0].mxu1 }
 0x3a5   : > { %v1292_v3 = vadd.f32 %v2775_v0, %v1155_v60  ;;  %v1283_v4 = vpop.f32.mrb[25].mxu0  ;;  %v1099_v6 = vadd.f32 %v2763_v2, %v4262_v33  ;;  %v1090_v7 = vpop.f32.mrb[1].mxu1  ;;  %v1163_v60 = vld [vmem:[%s4176_s11 + $0x50] sm:$0xff] }
 0x3a6   : > { %v1284_v8 = vadd.f32 %v1283_v4, %v1153_v62  ;;  %v2776_v9 = vpop.f32.mrb[26].mxu0  ;;  %2815 = vmatprep.mubr.msk.bf16.mxu0 %vm1554_vm1, %v4284_v63  ;;  %v1091_v10 = vadd.f32 %v4262_v33, %v1090_v7  ;;  %v2764_v11 = vpop.f32.mrb[2].mxu1 }
 0x3a7   : > { %v1295_v12 = vadd.f32 %v2776_v9, %v1156_v1  ;;  %v1286_v13 = vpop.f32.mrb[27].mxu0  ;;  %2816 = vmatmul.mubr.msk.bf16.gmra.mrb[44].mxu0 %vm1554_vm1, %v4281_v61  ;;  %v1131_v14 = vmax.f32 %v1099_v6, 0.0  ;;  %v1102_v15 = vadd.f32 %v2764_v11, %v4262_v33  ;;  %v1093_v16 = vpop.f32.mrb[3].mxu1  ;;  %v1348_v20 = vmax.f32 %v1292_v3, 0.0  ;;  %v1161_v1 = vld [vmem:[%s4176_s11 + $0x40] sm:$0xff]  ;;  %v1162_v9 = vld [vmem:[%s4176_s11 + $0x48] sm:$0xff] }
 0x3a8   : > { %v1287_v17 = vadd.f32 %v1286_v13, %v1154_v5  ;;  %v1129_v18 = vmax.f32 %v1091_v10, 0.0  ;;  %v1094_v19 = vadd.f32 %v4262_v33, %v1093_v16  ;;  %v1346_v23 = vmax.f32 %v1284_v8, 0.0  ;;  %v1164_v5 = vld [vmem:[%s4176_s11 + $0x58] sm:$0xff] }
 0x3a9   : > { %v1349_v21 = vmax.f32 %v1295_v12, 0.0  ;;  %v1132_v22 = vmax.f32 %v1102_v15, 0.0 }
 0x3aa   : > { %v1347_v24 = vmax.f32 %v1287_v17, 0.0  ;;  %v1130_v26 = vmax.f32 %v1094_v19, 0.0 }
 0x3ab   : > { %v1363_v27 = vpack.c.bf16 %v1349_v21, %v1348_v20  ;;  %v4298_v29 = vpack.c.bf16 %v1132_v22, %v1131_v14  ;;  %v1165_v20 = vld [vmem:[%s4176_s11 + $0x60] sm:$0xff] }
 0x3ac   : > { %v1362_v30 = vpack.c.bf16 %v1347_v24, %v1346_v23  ;;  %v2779_v31 = vpop.f32.mrb[28].mxu0  ;;  %v4301_v34 = vpack.c.bf16 %v1130_v26, %v1129_v18  ;;  %v2767_v35 = vpop.f32.mrb[4].mxu1  ;;  %v1167_v18 = vld [vmem:[%s4176_s11 + $0x70] sm:$0xff]  ;;  %v1168_v23 = vld [vmem:[%s4176_s11 + $0x78] sm:$0xff]  ;;  %v1166_v26 = vld [vmem:[%s4176_s11 + $0x68] sm:$0xff] }
 0x3ad   : > { %v1308_v36 = vadd.f32 %v2779_v31, %v1159_v25  ;;  %v1299_v37 = vpop.f32.mrb[29].mxu0  ;;  %v1115_v39 = vadd.f32 %v2767_v35, %v4262_v33  ;;  %v1106_v40 = vpop.f32.mrb[5].mxu1 }
 0x3ae   : > { %v1300_v41 = vadd.f32 %v1299_v37, %v1157_v28  ;;  %v2780_v42 = vpop.f32.mrb[30].mxu0  ;;  %2793 = vmatprep.mubr.msk.bf16.mxu1 %vm831_vm0, %v1362_v30  ;;  %v1107_v43 = vadd.f32 %v4262_v33, %v1106_v40  ;;  %v2768_v44 = vpop.f32.mrb[6].mxu1  ;;  %2819 = vmatprep.mubr.msk.bf16.mxu0 %vm1554_vm1, %v4301_v34 }
 0x3af   : > { %v1352_v45 = vmax.f32 %v1308_v36, 0.0  ;;  %v1311_v48 = vadd.f32 %v2780_v42, %v1160_v32  ;;  %v1302_v49 = vpop.f32.mrb[31].mxu0  ;;  %2794 = vmatmul.mubr.msk.bf16.vlgmr.msra.gmra.mrb[8].mxu1 %vm831_vm0, %v1363_v27  ;;  %v1135_v50 = vmax.f32 %v1115_v39, 0.0  ;;  %v1118_v51 = vadd.f32 %v2768_v44, %v4262_v33  ;;  %v1109_v52 = vpop.f32.mrb[7].mxu1  ;;  %2820 = vmatmul.mubr.msk.bf16.gmra.mrb[48].mxu0 %vm1554_vm1, %v4298_v29  ;;  %v3079_v42 = vld [vmem:[#allocation20] sm:$0xff]  }
 0x3b0   : > { %v1350_v53 = vmax.f32 %v1300_v41, 0.0  ;;  %v1303_v54 = vadd.f32 %v1302_v49, %v1158_v38  ;;  %v1133_v55 = vmax.f32 %v1107_v43, 0.0  ;;  %v1110_v56 = vadd.f32 %v4262_v33, %v1109_v52  ;;  %v3078_v41 = vld [vmem:[#allocation22] sm:$0xff]  }
 0x3b1   : > { %v1353_v57 = vmax.f32 %v1311_v48, 0.0  ;;  %v1136_v58 = vmax.f32 %v1118_v51, 0.0  ;;  %2827 = vmatprep.subr.bf16.mxu1 %v3078_v41 }
 0x3b2   : > { %v1351_v59 = vmax.f32 %v1303_v54, 0.0  ;;  %v1134_v62 = vmax.f32 %v1110_v56, 0.0  ;;  %2828 = vmatpush3.bf16.msra.mxu1 %v3078_v41 }
 0x3b3   : > { %v1365_v0 = vpack.c.bf16 %v1353_v57, %v1352_v45  ;;  %v4316_v2 = vpack.c.bf16 %v1136_v58, %v1135_v50  ;;  %2845 = vmatprep.subr.bf16.mxu1 %v3079_v42 }
 0x3b4   : > { %v1364_v3 = vpack.c.bf16 %v1351_v59, %v1350_v53  ;;  %v2783_v4 = vpop.f32.mrb[32].mxu0  ;;  %v4319_v6 = vpack.c.bf16 %v1134_v62, %v1133_v55  ;;  %v4352_v53 = vld [vmem:[#allocation17] ss:$0 sm:$0xff] }
 0x3b5   : > { %v1324_v7 = vadd.f32 %v2783_v4, %v1163_v60  ;;  %v1315_v8 = vpop.f32.mrb[33].mxu0 }
 0x3b6   : > { %v1316_v33 = vadd.f32 %v1315_v8, %v1161_v1  ;;  %v2784_v10 = vpop.f32.mrb[34].mxu0  ;;  %2797 = vmatprep.mubr.msk.bf16.mxu1 %vm831_vm0, %v1364_v3  ;;  %2823 = vmatprep.mubr.msk.bf16.mxu0 %vm1554_vm1, %v4319_v6 }
 0x3b7   : > { %v1356_v11 = vmax.f32 %v1324_v7, 0.0  ;;  %v1327_v12 = vadd.f32 %v2784_v10, %v1164_v5  ;;  %v1318_v13 = vpop.f32.mrb[35].mxu0  ;;  %2798 = vmatmul.mubr.msk.bf16.gmra.mrb[12].mxu1 %vm831_vm0, %v1365_v0  ;;  %2824 = vmatmul.mubr.msk.bf16.gmra.mrb[52].mxu0 %vm1554_vm1, %v4316_v2 }
 0x3b8   : > { %v1354_v14 = vmax.f32 %v1316_v33, 0.0  ;;  %v1319_v15 = vadd.f32 %v1318_v13, %v1162_v9 }
 0x3b9   : > { %v1357_v16 = vmax.f32 %v1327_v12, 0.0 }
 0x3ba   : > { %v1355_v17 = vmax.f32 %v1319_v15, 0.0 }
 0x3bb   : > { %v1367_v19 = vpack.c.bf16 %v1357_v16, %v1356_v11 }
 0x3bc   : > { %v1366_v21 = vpack.c.bf16 %v1355_v17, %v1354_v14  ;;  %v2787_v22 = vpop.f32.mrb[36].mxu0 }
 0x3bd   : > { %v1340_v24 = vadd.f32 %v2787_v22, %v1167_v18  ;;  %v1331_v25 = vpop.f32.mrb[37].mxu0 }
 0x3be   : > { %v1332_v27 = vadd.f32 %v1331_v25, %v1165_v20  ;;  %v2788_v28 = vpop.f32.mrb[38].mxu0  ;;  %2801 = vmatprep.mubr.msk.bf16.mxu1 %vm831_vm0, %v1366_v21 }
 0x3bf   : > { %v1360_v30 = vmax.f32 %v1340_v24, 0.0  ;;  %v1343_v31 = vadd.f32 %v2788_v28, %v1168_v23  ;;  %v1334_v32 = vpop.f32.mrb[39].mxu0  ;;  %2802 = vmatmul.mubr.msk.bf16.gmra.mrb[16].mxu1 %vm831_vm0, %v1367_v19 }
 0x3c0   : > { %v1358_v35 = vmax.f32 %v1332_v27, 0.0  ;;  %v1335_v36 = vadd.f32 %v1334_v32, %v1166_v26 }
 0x3c1   : > { %v1361_v37 = vmax.f32 %v1343_v31, 0.0 }
 0x3c2   : > { %v1359_v38 = vmax.f32 %v1335_v36, 0.0 }
 0x3c3   : > { %v1369_v39 = vpack.c.bf16 %v1361_v37, %v1360_v30 }
 0x3c4   : > { %v1368_v40 = vpack.c.bf16 %v1359_v38, %v1358_v35 }
 0x3c6   : > { %2805 = vmatprep.mubr.msk.bf16.mxu1 %vm831_vm0, %v1368_v40 }
 0x3c7   : > { %2806 = vmatmul.mubr.msk.bf16.gmra.mrb[20].mxu1 %vm831_vm0, %v1369_v39 }
 0x472   : > { %v4336_v43 = vpop.f32.mrb[40].mxu0 }
 0x473   : > { %v4338_v44 = vpop.f32.mrb[41].mxu0 }
 0x474   : > { %v4340_v45 = vpop.f32.mrb[42].mxu0 }
 0x475   : > { %v4342_v48 = vpop.f32.mrb[43].mxu0 }
 0x47a   : > { %v4344_v49 = vpop.f32.mrb[44].mxu0 }
 0x47b   : > { %v4346_v50 = vpop.f32.mrb[45].mxu0 }
 0x47c   : > { %v4348_v51 = vpop.f32.mrb[46].mxu0 }
 0x47d   : > { %v4350_v52 = vpop.f32.mrb[47].mxu0 }
 0x482   : > { %v2795_v54 = vpop.f32.mrb[8].mxu1  ;;  %v4354_v55 = vpop.f32.mrb[48].mxu0 }
 0x483   : > { %v1460_v56 = vadd.f32 %v2795_v54, %v4352_v53  ;;  %v1451_v57 = vpop.f32.mrb[9].mxu1  ;;  %v4357_v58 = vpop.f32.mrb[49].mxu0 }
 0x484   : > { %v1452_v59 = vadd.f32 %v4352_v53, %v1451_v57  ;;  %v2796_v60 = vpop.f32.mrb[10].mxu1  ;;  %v4360_v62 = vpop.f32.mrb[50].mxu0 }
 0x485   : > { %v1516_v0 = vmax.f32 %v1460_v56, 0.0  ;;  %v1463_v1 = vadd.f32 %v2796_v60, %v4352_v53  ;;  %v1454_v3 = vpop.f32.mrb[11].mxu1  ;;  %v4363_v4 = vpop.f32.mrb[51].mxu0 }
 0x486   : > { %v1514_v5 = vmax.f32 %v1452_v59, 0.0  ;;  %v1455_v7 = vadd.f32 %v4352_v53, %v1454_v3 }
 0x487   : > { %v1517_v8 = vmax.f32 %v1463_v1, 0.0  ;;  %1760 = vrot.lane.b32.xlu1 %v1516_v0, %s3598_s27  ;;  %v4368_v9 = vmul.f32 %v4336_v43, %v1516_v0 }
 0x488   : > { %v1515_v33 = vmax.f32 %v1455_v7, 0.0  ;;  %1756 = vrot.lane.b32.xlu0 %v1514_v5, %s3598_s27  ;;  %v4372_v10 = vmul.f32 %v4338_v44, %v1514_v5 }
 0x489   : > { %v1539_v11 = vpack.c.bf16 %v1517_v8, %v1516_v0  ;;  %v4375_v12 = vmul.f32 %v4340_v45, %v1517_v8 }
 0x48a   : > { %v1538_v13 = vpack.c.bf16 %v1515_v33, %v1514_v5  ;;  %v2799_v14 = vpop.f32.mrb[12].mxu1  ;;  %v4378_v15 = vmul.f32 %v4342_v48, %v1515_v33  ;;  %v4380_v16 = vpop.f32.mrb[52].mxu0 }
 0x48b   : > { %v1476_v17 = vadd.f32 %v2799_v14, %v4352_v53  ;;  %1762 = vrot.lane.b32.xlu1 %v1517_v8, %s3598_s27  ;;  %v1467_v18 = vpop.f32.mrb[13].mxu1  ;;  %v4384_v19 = vpop.f32.mrb[53].mxu0 }
 0x48c   : > { %v1468_v20 = vadd.f32 %v4352_v53, %v1467_v18  ;;  %v2800_v21 = vpop.f32.mrb[14].mxu1  ;;  %1758 = vrot.lane.b32.xlu0 %v1515_v33, %s3598_s27  ;;  %2829 = vmatprep.mubr.msk.bf16.mxu1 %vm1554_vm1, %v1538_v13  ;;  %v4389_v22 = vpop.f32.mrb[54].mxu0 }
 0x48d   : > { %v4391_v23 = vmax.f32 %v1476_v17, 0.0  ;;  %v1479_v24 = vadd.f32 %v2800_v21, %v4352_v53  ;;  %v1470_v25 = vpop.f32.mrb[15].mxu1  ;;  %2830 = vmatmul.mubr.msk.bf16.vlgmr.msra.gmra.mrb[24].mxu1 %vm1554_vm1, %v1539_v11  ;;  %v4395_v26 = vpop.f32.mrb[55].mxu0 }
 0x48e   : > { %v4397_v27 = vmax.f32 %v1468_v20, 0.0  ;;  %v1471_v28 = vadd.f32 %v4352_v53, %v1470_v25  ;;  %2846 = vmatpush3.bf16.msra.mxu1 %v3079_v42 }
 0x48f   : > { %v1521_v30 = vmax.f32 %v1479_v24, 0.0  ;;  %v4402_v31 = vmul.f32 %v4344_v49, %v4391_v23 }
 0x490   : > { %v1519_v32 = vmax.f32 %v1471_v28, 0.0  ;;  %v1680_v35 = vmul.f32 %v4346_v50, %v4397_v27 }
 0x491   : > { %v1541_v36 = vpack.c.bf16 %v1521_v30, %v4391_v23  ;;  %v4408_v37 = vmul.f32 %v4348_v51, %v1521_v30 }
 0x492   : > { %v1540_v38 = vpack.c.bf16 %v1519_v32, %v4397_v27  ;;  %v2803_v39 = vpop.f32.mrb[16].mxu1  ;;  %v1681_v40 = vmul.f32 %v4350_v52, %v1519_v32 }
 0x493   : > { %v1492_v41 = vadd.f32 %v2803_v39, %v4352_v53  ;;  %v1483_v42 = vpop.f32.mrb[17].mxu1 }
 0x494   : > { %v1484_v54 = vadd.f32 %v4352_v53, %v1483_v42  ;;  %v2804_v56 = vpop.f32.mrb[18].mxu1  ;;  %2833 = vmatprep.mubr.msk.bf16.mxu1 %vm1554_vm1, %v1540_v38  ;;  %v1695_v42 = vsel %vm1554_vm1, %v4378_v15, 0.0 }
 0x495   : > { %v4415_v57 = vmax.f32 %v1492_v41, 0.0  ;;  %v1495_v59 = vadd.f32 %v2804_v56, %v4352_v53  ;;  %v1486_v60 = vpop.f32.mrb[19].mxu1  ;;  %2834 = vmatmul.mubr.msk.bf16.gmra.mrb[28].mxu1 %vm1554_vm1, %v1541_v36  ;;  %v1692_v41 = vsel %vm1554_vm1, %v4372_v10, 0.0 }
 0x496   : > { %v4419_v0 = vmax.f32 %v1484_v54, 0.0  ;;  %v1487_v1 = vadd.f32 %v4352_v53, %v1486_v60 }
 0x497   : > { %v4422_v3 = vmax.f32 %v1495_v59, 0.0 }
 0x498   : > { %v4424_v5 = vmax.f32 %v1487_v1, 0.0 }
 0x499   : > { %v1543_v7 = vpack.c.bf16 %v4422_v3, %v4415_v57 }
 0x49a   : > { %v1542_v8 = vpack.c.bf16 %v4424_v5, %v4419_v0  ;;  %v2807_v33 = vpop.f32.mrb[20].mxu1 }
 0x49b   : > { %v1508_v11 = vadd.f32 %v2807_v33, %v4352_v53  ;;  %v1499_v13 = vpop.f32.mrb[21].mxu1 }
 0x49c   : > { %v1500_v14 = vadd.f32 %v4352_v53, %v1499_v13  ;;  %v2808_v17 = vpop.f32.mrb[22].mxu1  ;;  %2837 = vmatprep.mubr.msk.bf16.mxu1 %vm1554_vm1, %v1542_v8 }
 0x49d   : > { %v4433_v18 = vmax.f32 %v1508_v11, 0.0  ;;  %v1511_v20 = vadd.f32 %v2808_v17, %v4352_v53  ;;  %v1502_v21 = vpop.f32.mrb[23].mxu1  ;;  %2838 = vmatmul.mubr.msk.bf16.gmra.mrb[32].mxu1 %vm1554_vm1, %v1543_v7 }
 0x49e   : > { %v4437_v24 = vmax.f32 %v1500_v14, 0.0  ;;  %v1503_v25 = vadd.f32 %v4352_v53, %v1502_v21  ;;  %v1698_v53 = vsel %vm1554_vm1, %v4368_v9, 0.0 }
 0x49f   : > { %v4440_v28 = vmax.f32 %v1511_v20, 0.0 }
 0x4a0   : > { %v4442_v36 = vmax.f32 %v1503_v25, 0.0 }
 0x4a1   : > { %v1545_v38 = vpack.c.bf16 %v4440_v28, %v4433_v18 }
 0x4a2   : > { %v1544_v39 = vpack.c.bf16 %v4442_v36, %v4437_v24 }
 0x4a4   : > { %2841 = vmatprep.mubr.msk.bf16.mxu1 %vm1554_vm1, %v1544_v39 }
 0x4a5   : > { %2842 = vmatmul.mubr.msk.bf16.gmra.mrb[36].mxu1 %vm1554_vm1, %v1545_v38 }
 0x4a6   : > { %2847 = vmatprep.mubr.msk.bf16.mxu1 %vm1554_vm1, %v4270_v47  ;;  %v1701_v47 = vsel %vm1554_vm1, %v4375_v12, 0.0 }
 0x4ab   : > { %1699 = vadd.xlane.f32.xlu0 %v1698_v53 }
 0x4ad   : > { %2848 = vmatmul.mubr.msk.bf16.vlgmr.msra.gmra.mrb[24].mxu1 %vm1554_vm1, %v4268_v46  ;;  %v1704_v46 = vsel %vm1554_vm1, %v1680_v35, 0.0 }
 0x4ae   : > { %2851 = vmatprep.mubr.msk.bf16.mxu1 %vm1554_vm1, %v4284_v63  ;;  %v1710_v63 = vsel %vm1554_vm1, %v4402_v31, 0.0 }
 0x4af   : > { %1693 = vadd.xlane.f32.xlu0 %v1692_v41  ;;  %1696 = vadd.xlane.f32.xlu1 %v1695_v42 }
 0x4b3   : > { %1702 = vadd.xlane.f32.xlu0 %v1701_v47 }
 0x4b5   : > { %2852 = vmatmul.mubr.msk.bf16.gmra.mrb[28].mxu1 %vm1554_vm1, %v4281_v61  ;;  %v1707_v61 = vsel %vm1554_vm1, %v1681_v40, 0.0 }
 0x4b6   : > { %2855 = vmatprep.mubr.msk.bf16.mxu1 %vm1554_vm1, %v4301_v34 }
 0x4bd   : > { %2856 = vmatmul.mubr.msk.bf16.gmra.mrb[32].mxu1 %vm1554_vm1, %v4298_v29  ;;  %v1713_v29 = vsel %vm1554_vm1, %v4408_v37, 0.0 }
 0x4be   : > { %2859 = vmatprep.mubr.msk.bf16.mxu1 %vm1554_vm1, %v4319_v6 }
 0x4c0   : > { %1770 = vrot.lane.b32.xlu1 %v1521_v30, %s3598_s27 }
 0x4c4   : > { %1766 = vrot.lane.b32.xlu1 %v1519_v32, %s3598_s27 }
 0x4c5   : > { %2860 = vmatmul.mubr.msk.bf16.gmra.mrb[36].mxu1 %vm1554_vm1, %v4316_v2 }
 0x4c9   : > { %1768 = vrot.lane.b32.xlu0 %v4391_v23, %s3598_s27 }
 0x4cd   : > { %1764 = vrot.lane.b32.xlu0 %v4397_v27, %s3598_s27 }
 0x4e8   : > { %1705 = vadd.xlane.f32.xlu1 %v1704_v46 }
 0x4ec   : > { %1708 = vadd.xlane.f32.xlu0 %v1707_v61 }
 0x4f9   : > { %1778 = vrot.lane.b32.xlu1 %v4422_v3, %s3598_s27  ;;  %v1761_v2 = vpop.permute.xlu1 %1760 }
 0x4fa   : > { %v1757_v34 = vpop.permute.xlu0 %1756  ;;  %v1806_v32 = vmul.f32 %v4336_v43, %v1761_v2 }
 0x4fd   : > { %1774 = vrot.lane.b32.xlu1 %v4424_v5, %s3598_s27  ;;  %v1763_v9 = vpop.permute.xlu1 %1762 }
 0x4fe   : > { %v1759_v6 = vpop.permute.xlu0 %1758  ;;  %v1807_v10 = vmul.f32 %v4340_v45, %v1763_v9 }
 0x4ff   : > { %v1805_v15 = vmul.f32 %v1759_v6, %v4342_v48  ;;  %v1804_v48 = vmul.f32 %v1757_v34, %v4338_v44  ;;  %v4570_v6 = vld [vmem:[#allocation23] ss:$0 sm:$0xff] }
 0x501   : > { %1786 = vrot.lane.b32.xlu1 %v4440_v28, %s3598_s27 }
 0x502   : > { %1776 = vrot.lane.b32.xlu0 %v4415_v57, %s3598_s27 }
 0x505   : > { %1782 = vrot.lane.b32.xlu1 %v4442_v36, %s3598_s27 }
 0x506   : > { %1772 = vrot.lane.b32.xlu0 %v4419_v0, %s3598_s27 }
 0x50a   : > { %1784 = vrot.lane.b32.xlu0 %v4433_v18, %s3598_s27 }
 0x50e   : > { %1780 = vrot.lane.b32.xlu0 %v4437_v24, %s3598_s27 }
 0x529   : > { %1711 = vadd.xlane.f32.xlu1 %v1710_v63 }
 0x52d   : > { %1714 = vadd.xlane.f32.xlu0 %v1713_v29 }
 0x538   : > { %v4503_v12 = vpop.xlane.xlu0 %1699 }
 0x53a   : > { %1842 = vrot.lane.b32.xlu1 %v1807_v10, %s3599_s0 }
 0x53c   : > { %v4507_v23 = vpop.xlane.xlu0 %1693  ;;  %v4509_v27 = vpop.xlane.xlu1 %1696 }
 0x53e   : > { %1838 = vrot.lane.b32.xlu1 %v1805_v15, %s3599_s0 }
 0x540   : > { %v4512_v30 = vpop.xlane.xlu0 %1702  ;;  %v1771_v31 = vpop.permute.xlu1 %1770 }
 0x541   : > { %v1811_v45 = vmul.f32 %v4348_v51, %v1771_v31 }
 0x543   : > { %1850 = vrot.lane.b32.xlu1 %v1811_v45, %s3599_s0  ;;  %1840 = vrot.lane.b32.xlu0 %v1806_v32, %s3599_s0 }
 0x544   : > { %v1769_v35 = vpop.permute.xlu0 %1768  ;;  %v1767_v37 = vpop.permute.xlu1 %1766 }
 0x545   : > { %v1809_v40 = vmul.f32 %v1767_v37, %v4350_v52  ;;  %v1810_v54 = vmul.f32 %v4344_v49, %v1769_v35 }
 0x547   : > { %1846 = vrot.lane.b32.xlu1 %v1809_v40, %s3599_s0  ;;  %1836 = vrot.lane.b32.xlu0 %v1804_v48, %s3599_s0  ;;  %v1684_v48 = vmul.f32 %v4357_v58, %v4419_v0  ;;  %v1685_v40 = vmul.f32 %v4363_v4, %v4424_v5 }
 0x548   : > { %v1765_v56 = vpop.permute.xlu0 %1764 }
 0x549   : > { %v1808_v43 = vmul.f32 %v1765_v56, %v4346_v50  ;;  %v1687_v56 = vmul.f32 %v4360_v62, %v4422_v3 }
 0x54b   : > { %1848 = vrot.lane.b32.xlu0 %v1810_v54, %s3599_s0  ;;  %v1686_v54 = vmul.f32 %v4354_v55, %v4415_v57 }
 0x54d   : > { %v1722_v0 = vsel %vm1554_vm1, %v1686_v54, 0.0 }
 0x54f   : > { %1844 = vrot.lane.b32.xlu0 %v1808_v43, %s3599_s0  ;;  %v1719_v43 = vsel %vm1554_vm1, %v1685_v40, 0.0 }
 0x575   : > { %v4526_v51 = vpop.xlane.xlu1 %1705 }
 0x579   : > { %v1779_v59 = vpop.permute.xlu1 %1778  ;;  %v4528_v60 = vpop.xlane.xlu0 %1708 }
 0x57a   : > { %v1815_v44 = vmul.f32 %v4360_v62, %v1779_v59  ;;  %v1716_v59 = vsel %vm1554_vm1, %v1684_v48, 0.0  ;;  %v1691_v62 = vmul.f32 %v4389_v22, %v4440_v28 }
 0x57c   : > { %1858 = vrot.lane.b32.xlu1 %v1815_v44, %s3599_s0  ;;  %v1688_v44 = vmul.f32 %v4384_v19, %v4437_v24 }
 0x57d   : > { %v1775_v52 = vpop.permute.xlu1 %1774  ;;  %v1777_v1 = vpop.permute.xlu0 %1776 }
 0x57e   : > { %v1813_v49 = vmul.f32 %v1775_v52, %v4363_v4  ;;  %v1814_v7 = vmul.f32 %v4354_v55, %v1777_v1  ;;  %v1725_v4 = vsel %vm1554_vm1, %v1687_v56, 0.0  ;;  %v1690_v55 = vmul.f32 %v4380_v16, %v4433_v18 }
 0x57f   : > { %v1728_v3 = vsel %vm1554_vm1, %v1688_v44, 0.0 }
 0x580   : > { %v4534_v8 = vpop.f32.mrb[24].mxu1  ;;  %1856 = vrot.lane.b32.xlu0 %v1814_v7, %s3599_s0  ;;  %1854 = vrot.lane.b32.xlu1 %v1813_v49, %s3599_s0  ;;  %v1734_v5 = vsel %vm1554_vm1, %v1690_v55, 0.0 }
 0x581   : > { %v4538_v50 = vpop.f32.mrb[25].mxu1  ;;  %v1787_v33 = vpop.permute.xlu1 %1786 }
 0x582   : > { %v1819_v11 = vmul.f32 %v4389_v22, %v1787_v33  ;;  %v1773_v13 = vpop.permute.xlu0 %1772  ;;  %v4541_v14 = vpop.f32.mrb[26].mxu1 }
 0x583   : > { %v1812_v17 = vmul.f32 %v1773_v13, %v4357_v58  ;;  %v4544_v20 = vpop.f32.mrb[27].mxu1  ;;  %v1689_v58 = vmul.f32 %v4395_v26, %v4442_v36 }
 0x584   : > { %1866 = vrot.lane.b32.xlu1 %v1819_v11, %s3599_s0 }
 0x585   : > { %1852 = vrot.lane.b32.xlu0 %v1812_v17, %s3599_s0  ;;  %v1783_v21 = vpop.permute.xlu1 %1782  ;;  %v1731_v57 = vsel %vm1554_vm1, %v1689_v58, 0.0 }
 0x586   : > { %v1817_v25 = vmul.f32 %v1783_v21, %v4395_v26  ;;  %v1785_v38 = vpop.permute.xlu0 %1784  ;;  %v1737_v26 = vsel %vm1554_vm1, %v1691_v62, 0.0 }
 0x587   : > { %v1818_v39 = vmul.f32 %v4380_v16, %v1785_v38 }
 0x588   : > { %v4550_v53 = vpop.f32.mrb[28].mxu1  ;;  %1862 = vrot.lane.b32.xlu1 %v1817_v25, %s3599_s0 }
 0x589   : > { %1864 = vrot.lane.b32.xlu0 %v1818_v39, %s3599_s0  ;;  %v4554_v41 = vpop.f32.mrb[29].mxu1 }
 0x58a   : > { %v1781_v42 = vpop.permute.xlu0 %1780  ;;  %v4556_v47 = vpop.f32.mrb[30].mxu1 }
 0x58b   : > { %v1816_v46 = vmul.f32 %v1781_v42, %v4384_v19  ;;  %v4559_v61 = vpop.f32.mrb[31].mxu1 }
 0x58d   : > { %1860 = vrot.lane.b32.xlu0 %v1816_v46, %s3599_s0 }
 0x590   : > { %v4562_v63 = vpop.f32.mrb[32].mxu1 }
 0x591   : > { %v4564_v29 = vpop.f32.mrb[33].mxu1 }
 0x592   : > { %v4566_v34 = vpop.f32.mrb[34].mxu1 }
 0x593   : > { %v4568_v2 = vpop.f32.mrb[35].mxu1 }
 0x598   : > { %v2861_v9 = vpop.f32.mrb[36].mxu1 }
 0x599   : > { %v4573_v10 = vadd.f32 %v2861_v9, %v4570_v6  ;;  %v2207_v15 = vpop.f32.mrb[37].mxu1 }
 0x59a   : > { %v4576_v31 = vadd.f32 %v4570_v6, %v2207_v15  ;;  %v2862_v32 = vpop.f32.mrb[38].mxu1 }
 0x59b   : > { %v4579_v45 = vadd.f32 %v2862_v32, %v4570_v6  ;;  %v2210_v35 = vpop.f32.mrb[39].mxu1 }
 0x59c   : > { %v4582_v37 = vadd.f32 %v4570_v6, %v2210_v35 }
 0x5ac   : > { %1720 = vadd.xlane.f32.xlu0 %v1719_v43  ;;  %1717 = vadd.xlane.f32.xlu1 %v1716_v59 }
 0x5b0   : > { %1726 = vadd.xlane.f32.xlu0 %v1725_v4  ;;  %1723 = vadd.xlane.f32.xlu1 %v1722_v0 }
 0x5b4   : > { %1732 = vadd.xlane.f32.xlu0 %v1731_v57  ;;  %1729 = vadd.xlane.f32.xlu1 %v1728_v3  ;;  %v1932_v3 = vlaneseq }
 0x5b6   : > { %v4606_v19 = vpop.xlane.xlu1 %1711 }
 0x5b8   : > { %1738 = vadd.xlane.f32.xlu0 %v1737_v26  ;;  %1735 = vadd.xlane.f32.xlu1 %v1734_v5 }
 0x5ba   : > { %v1843_v24 = vpop.permute.xlu1 %1842  ;;  %v4610_v36 = vpop.xlane.xlu0 %1714 }
 0x5bb   : > { %v1893_v16 = vsel %vm1554_vm1, %v1843_v24, 0.0  ;;  %v4640_v24 = vand.u32 127, %v1932_v3 }
 0x5bc   : > { %1894 = vadd.xlane.f32.xlu0 %v1893_v16 }
 0x5bd   : > { %vm1953_vm2 = vcmp.eq.s32.totalorder %v4640_v24, 1  ;;  %vm1934_vm3 = vcmp.eq.s32.totalorder %v4640_v24, 0 }
 0x5be   : > { %v1839_v22 = vpop.permute.xlu1 %1838  ;;  %v1841_v18 = vpop.permute.xlu0 %1840 }
 0x5bf   : > { %v1890_v28 = vsel %vm1554_vm1, %v1841_v18, 0.0  ;;  %v1887_v52 = vsel %vm1554_vm1, %v1839_v22, 0.0 }
 0x5c0   : > { %1891 = vadd.xlane.f32.xlu1 %v1890_v28  ;;  %1888 = vadd.xlane.f32.xlu0 %v1887_v52  ;;  %v1940_v28 = vsel %vm1934_vm3, %v4512_v30, 0.0 }
 0x5c2   : > { %v1851_v1 = vpop.permute.xlu1 %1850  ;;  %v1837_v49 = vpop.permute.xlu0 %1836 }
 0x5c3   : > { %v1884_v7 = vsel %vm1554_vm1, %v1837_v49, 0.0  ;;  %v1905_v33 = vsel %vm1554_vm1, %v1851_v1, 0.0  ;;  %v2232_v1 = vadd.f32 %v4541_v14, %v4570_v6  ;;  %v2231_v14 = vadd.f32 %v4534_v8, %v4570_v6 }
 0x5c4   : > { %1885 = vadd.xlane.f32.xlu1 %v1884_v7  ;;  %1906 = vadd.xlane.f32.xlu0 %v1905_v33  ;;  %v1944_v8 = vsel %vm1934_vm3, %v4610_v36, 0.0 }
 0x5c6   : > { %v1847_v11 = vpop.permute.xlu1 %1846  ;;  %v1849_v13 = vpop.permute.xlu0 %1848 }
 0x5c7   : > { %v1902_v17 = vsel %vm1554_vm1, %v1849_v13, 0.0  ;;  %v1899_v21 = vsel %vm1554_vm1, %v1847_v11, 0.0  ;;  %v1939_v13 = vsel %vm1934_vm3, %v4503_v12, 0.0 }
 0x5c8   : > { %1903 = vadd.xlane.f32.xlu1 %v1902_v17  ;;  %1900 = vadd.xlane.f32.xlu0 %v1899_v21  ;;  %v1938_v17 = vsel %vm1934_vm3, %v4509_v27, 0.0 }
 0x5ca   : > { %v1845_v25 = vpop.permute.xlu0 %1844 }
 0x5cb   : > { %v1896_v38 = vsel %vm1554_vm1, %v1845_v25, 0.0  ;;  %v2230_v25 = vadd.f32 %v4570_v6, %v4544_v20 }
 0x5cc   : > { %1897 = vadd.xlane.f32.xlu1 %v1896_v38 }
 0x5ee   : > { %v1859_v39 = vpop.permute.xlu1 %1858 }
 0x5ef   : > { %v1917_v42 = vsel %vm1554_vm1, %v1859_v39, 0.0 }
 0x5f0   : > { %1918 = vadd.xlane.f32.xlu0 %v1917_v42 }
 0x5f2   : > { %v1857_v46 = vpop.permute.xlu0 %1856  ;;  %v1855_v9 = vpop.permute.xlu1 %1854 }
 0x5f3   : > { %v1914_v15 = vsel %vm1554_vm1, %v1857_v46, 0.0  ;;  %v1911_v32 = vsel %vm1554_vm1, %v1855_v9, 0.0  ;;  %v1937_v9 = vsel %vm1934_vm3, %v4507_v23, 0.0 }
 0x5f4   : > { %1915 = vadd.xlane.f32.xlu1 %v1914_v15  ;;  %1912 = vadd.xlane.f32.xlu0 %v1911_v32  ;;  %v2229_v32 = vadd.f32 %v4570_v6, %v4538_v50  ;;  %v1943_v50 = vsel %vm1934_vm3, %v4606_v19, 0.0 }
 0x5f6   : > { %v1867_v35 = vpop.permute.xlu1 %1866 }
 0x5f7   : > { %v1853_v48 = vpop.permute.xlu0 %1852  ;;  %v1929_v44 = vsel %vm1554_vm1, %v1867_v35, 0.0  ;;  %v2236_v35 = vadd.f32 %v4556_v47, %v4570_v6 }
 0x5f8   : > { %v1908_v40 = vsel %vm1554_vm1, %v1853_v48, 0.0 }
 0x5f9   : > { %1909 = vadd.xlane.f32.xlu1 %v1908_v40 }
 0x5fa   : > { %v1863_v54 = vpop.permute.xlu1 %1862 }
 0x5fb   : > { %v1865_v56 = vpop.permute.xlu0 %1864  ;;  %v1923_v43 = vsel %vm1554_vm1, %v1863_v54, 0.0 }
 0x5fc   : > { %1924 = vadd.xlane.f32.xlu0 %v1923_v43  ;;  %v1926_v4 = vsel %vm1554_vm1, %v1865_v56, 0.0  ;;  %v1942_v43 = vsel %vm1934_vm3, %v4528_v60, 0.0 }
 0x5ff   : > { %v1861_v59 = vpop.permute.xlu0 %1860 }
 0x600   : > { %v1920_v58 = vsel %vm1554_vm1, %v1861_v59, 0.0  ;;  %1930 = vadd.xlane.f32.xlu0 %v1929_v44  ;;  %v2235_v44 = vadd.f32 %v4550_v53, %v4570_v6  ;;  %v2233_v53 = vadd.f32 %v4570_v6, %v4554_v41 }
 0x601   : > { %1921 = vadd.xlane.f32.xlu1 %v1920_v58  ;;  %v2234_v58 = vadd.f32 %v4570_v6, %v4559_v61 }
 0x605   : > { %1927 = vadd.xlane.f32.xlu1 %v1926_v4 }
 0x639   : > { %v4628_v0 = vpop.xlane.xlu0 %1720  ;;  %v4630_v55 = vpop.xlane.xlu1 %1717 }
 0x63d   : > { %v4632_v62 = vpop.xlane.xlu0 %1726  ;;  %v4634_v57 = vpop.xlane.xlu1 %1723 }
 0x641   : > { %v4636_v26 = vpop.xlane.xlu0 %1732  ;;  %v4638_v5 = vpop.xlane.xlu1 %1729 }
 0x645   : > { %v4642_v16 = vpop.xlane.xlu0 %1738  ;;  %v4646_v22 = vpop.xlane.xlu1 %1735 }
 0x649   : > { %v1895_v18 = vpop.xlane.xlu0 %1894 }
 0x64a   : > { %v1959_v52 = vsel %vm1953_vm2, %v1895_v18, 0.0 }
 0x64b   : > { %v1975_v49 = vadd.f32 %v1959_v52, %v1940_v28  ;;  %v1941_v28 = vsel %vm1934_vm3, %v4526_v51, 0.0 }
 0x64d   : > { %v2248_v7 = vadd.f32 %v2232_v1, %v1975_v49  ;;  %v1892_v33 = vpop.xlane.xlu1 %1891  ;;  %v1889_v11 = vpop.xlane.xlu0 %1888 }
 0x64e   : > { %v1958_v30 = vsel %vm1953_vm2, %v1892_v33, 0.0  ;;  %v1957_v21 = vsel %vm1953_vm2, %v1889_v11, 0.0  ;;  %v2240_v33 = vadd.f32 %v4566_v34, %v4570_v6 }
 0x64f   : > { %2264 = vst [vmem:[%s4670_s8 + $0x18] sm:$0xff] %v2248_v7  ;;  %v1974_v12 = vadd.f32 %v1958_v30, %v1939_v13  ;;  %v1973_v27 = vadd.f32 %v1957_v21, %v1938_v17  ;;  %v1948_v7 = vsel %vm1934_vm3, %v4632_v62, 0.0  ;;  %v1946_v30 = vsel %vm1934_vm3, %v4628_v0, 0.0 }
 0x650   : > { %v1947_v62 = vsel %vm1934_vm3, %v4634_v57, 0.0  ;;  %v1945_v57 = vsel %vm1934_vm3, %v4630_v55, 0.0 }
 0x651   : > { %v2247_v38 = vadd.f32 %v2231_v14, %v1974_v12  ;;  %v2246_v39 = vadd.f32 %v2230_v25, %v1973_v27  ;;  %v1886_v42 = vpop.xlane.xlu1 %1885  ;;  %v1907_v46 = vpop.xlane.xlu0 %1906  ;;  %v2239_v14 = vadd.f32 %v4562_v63, %v4570_v6  ;;  %v2238_v25 = vadd.f32 %v4570_v6, %v4568_v2 }
 0x652   : > { %v1956_v20 = vsel %vm1953_vm2, %v1886_v42, 0.0  ;;  %v1963_v15 = vsel %vm1953_vm2, %v1907_v46, 0.0  ;;  %v2237_v2 = vadd.f32 %v4570_v6, %v4564_v29  ;;  %v1952_v29 = vsel %vm1934_vm3, %v4642_v16, 0.0 }
 0x653   : > { %2263 = vst [vmem:[%s4670_s8 + $0x10] sm:$0xff] %v2247_v38  ;;  %2262 = vst [vmem:[%s4670_s8 + $0x8] sm:$0xff] %v2246_v39  ;;  %v1972_v23 = vadd.f32 %v1956_v20, %v1937_v9  ;;  %v1979_v48 = vadd.f32 %v1963_v15, %v1944_v8  ;;  %v1950_v9 = vsel %vm1934_vm3, %v4636_v26, 0.0 }
 0x655   : > { %v2245_v40 = vadd.f32 %v2229_v32, %v1972_v23  ;;  %v2252_v36 = vadd.f32 %v2236_v35, %v1979_v48  ;;  %v1904_v54 = vpop.xlane.xlu1 %1903  ;;  %v1901_v56 = vpop.xlane.xlu0 %1900  ;;  %v1949_v35 = vsel %vm1934_vm3, %v4638_v5, 0.0  ;;  %v1951_v5 = vsel %vm1934_vm3, %v4646_v22, 0.0 }
 0x656   : > { %v1962_v47 = vsel %vm1953_vm2, %v1904_v54, 0.0  ;;  %v1961_v59 = vsel %vm1953_vm2, %v1901_v56, 0.0 }
 0x657   : > { %2261 = vst [vmem:[%s4670_s8] sm:$0xff] %v2245_v40  ;;  %2268 = vst [vmem:[%s4670_s8 + $0x38] sm:$0xff] %v2252_v36  ;;  %v1978_v60 = vadd.f32 %v1962_v47, %v1943_v50  ;;  %v1977_v4 = vadd.f32 %v1961_v59, %v1942_v43 }
 0x659   : > { %v2251_v3 = vadd.f32 %v2235_v44, %v1978_v60  ;;  %v2250_v19 = vadd.f32 %v2234_v58, %v1977_v4  ;;  %v1898_v18 = vpop.xlane.xlu1 %1897 }
 0x65a   : > { %v1960_v52 = vsel %vm1953_vm2, %v1898_v18, 0.0 }
 0x65b   : > { %2267 = vst [vmem:[%s4670_s8 + $0x30] sm:$0xff] %v2251_v3  ;;  %2266 = vst [vmem:[%s4670_s8 + $0x28] sm:$0xff] %v2250_v19  ;;  %v1976_v61 = vadd.f32 %v1960_v52, %v1941_v28 }
 0x65d   : > { %v2249_v1 = vadd.f32 %v2233_v53, %v1976_v61 }
 0x65f   : > { %2265 = vst [vmem:[%s4670_s8 + $0x20] sm:$0xff] %v2249_v1 }
 0x67d   : > { %v1919_v49 = vpop.xlane.xlu0 %1918 }
 0x67e   : > { %v1967_v51 = vsel %vm1953_vm2, %v1919_v49, 0.0 }
 0x67f   : > { %v1983_v11 = vadd.f32 %v1967_v51, %v1948_v7 }
 0x681   : > { %v2256_v13 = vadd.f32 %v2240_v33, %v1983_v11  ;;  %v1916_v41 = vpop.xlane.xlu1 %1915  ;;  %v1913_v17 = vpop.xlane.xlu0 %1912 }
 0x682   : > { %v1966_v21 = vsel %vm1953_vm2, %v1916_v41, 0.0  ;;  %v1965_v34 = vsel %vm1953_vm2, %v1913_v17, 0.0 }
 0x683   : > { %2272 = vst [vmem:[%s4670_s8 + $0x58] sm:$0xff] %v2256_v13  ;;  %v1982_v12 = vadd.f32 %v1966_v21, %v1947_v62  ;;  %v1981_v0 = vadd.f32 %v1965_v34, %v1946_v30 }
 0x685   : > { %v2255_v27 = vadd.f32 %v2239_v14, %v1982_v12  ;;  %v2254_v38 = vadd.f32 %v2238_v25, %v1981_v0 }
 0x686   : > { %v1910_v39 = vpop.xlane.xlu1 %1909 }
 0x687   : > { %2271 = vst [vmem:[%s4670_s8 + $0x50] sm:$0xff] %v2255_v27  ;;  %2270 = vst [vmem:[%s4670_s8 + $0x48] sm:$0xff] %v2254_v38  ;;  %v1964_v63 = vsel %vm1953_vm2, %v1910_v39, 0.0 }
 0x688   : > { %v1980_v42 = vadd.f32 %v1964_v63, %v1945_v57 }
 0x689   : > { %v1925_v46 = vpop.xlane.xlu0 %1924 }
 0x68a   : > { %v2253_v8 = vadd.f32 %v2237_v2, %v1980_v42  ;;  %v1969_v20 = vsel %vm1953_vm2, %v1925_v46, 0.0 }
 0x68b   : > { %v1985_v55 = vadd.f32 %v1969_v20, %v1950_v9 }
 0x68c   : > { %2269 = vst [vmem:[%s4670_s8 + $0x40] sm:$0xff] %v2253_v8 }
 0x68d   : > { %v2258_v15 = vadd.f32 %v4582_v37, %v1985_v55  ;;  %v1931_v32 = vpop.xlane.xlu0 %1930 }
 0x68e   : > { %v1922_v6 = vpop.xlane.xlu1 %1921  ;;  %v1971_v26 = vsel %vm1953_vm2, %v1931_v32, 0.0 }
 0x68f   : > { %2274 = vst [vmem:[%s4670_s8 + $0x68] sm:$0xff] %v2258_v15  ;;  %v1968_v23 = vsel %vm1953_vm2, %v1922_v6, 0.0  ;;  %v1987_v37 = vadd.f32 %v1971_v26, %v1952_v29 }
 0x690   : > { %v1984_v48 = vadd.f32 %v1968_v23, %v1949_v35 }
 0x691   : > { %v2260_v40 = vadd.f32 %v4579_v45, %v1987_v37 }
 0x692   : > { %v2257_v16 = vadd.f32 %v4576_v31, %v1984_v48  ;;  %v1928_v36 = vpop.xlane.xlu1 %1927 }
 0x693   : > { %2276 = vst [vmem:[%s4670_s8 + $0x78] sm:$0xff] %v2260_v40  ;;  %v1970_v54 = vsel %vm1953_vm2, %v1928_v36, 0.0 }
 0x694   : > { %2273 = vst [vmem:[%s4670_s8 + $0x60] sm:$0xff] %v2257_v16  ;;  %v1986_v56 = vadd.f32 %v1970_v54, %v1951_v5 }
 0x696   : > { %v2259_v31 = vadd.f32 %v4573_v10, %v1986_v56 }
 0x698   : > { %2275 = vst [vmem:[%s4670_s8 + $0x70] sm:$0xff] %v2259_v31 }
 0x699   : > { %3493 = shalt.err (!%p3490_p12)
}
 0x69a   : > { %s3494_s13 = scalar_lea.hbm %s4778_s6, 2048  ;;  %s3498_s21 = scalar_lea.hbm %s4948_s4, 4096 }
 0x69b   : > { %p3495_p10 = scmp.ne.s32.totalorder %s4778_s6, %s3494_s13  ;;  %p3499_p13 = scmp.lt.u32.totalorder %s4778_s6, %s4948_s4 }
 0x69c   : > { %p3500_p5 = scmp.lt.u32.totalorder %s3498_s21, %s3494_s13  ;;  %p3502_p6 = scmp.lt.u32.totalorder %s3494_s13, %s4778_s6 }
 0x69d   : > { %p3496_p11 = pnand %p3495_p10, %p4949_p3 }
 0x69e   : > { %p3501_p7 = por %p3500_p5, %p3499_p13 }
 0x69f   : > { %p3497_p2 = pneg %p3496_p11 }
 0x6a0   : > { %p3503_p1 = por %p3502_p6, %p3501_p7 }
 0x6a2   : > { %p3504_p8 = pnand %p3503_p1, %p3497_p2 }
 0x6a4   : > { %3507 = shalt.err (!%p3504_p8)
}
 0x6a5   : > { %s3601_s12 = smov 128   ;;  %s3602_s11 = smov 8  }
 0x6a6   : > { %2931 = dma.vmem_to_hbm [thread:$0]  (%p4949_p3), %s4780_s5, 2048, %s4778_s6, %s2278_s19, %s3601_s12, %s3601_s12, %s3602_s11  }
 0x6a7 PF: > { %s4950_s27 = sld [smem:[#allocation36_spill]]  ;;  %s4951_s0 = sld [smem:[#allocation42_spill]] }
 0x6a8   : > { %p4953_p9 = scmp.ge.s32.totalorder %s3578_s16, 2 }
 0x6ad   : > { %s2306_s8 = sand.u32 1, %s4950_s27   ;;  %p4952_p0 = scmp.ne.s32.totalorder %s4951_s0, 0 }
 0x6ae   : > { %s2307_s17 = scalar_lea.sflag [#allocation4], %s2306_s8 }
 0x6af   : > { %p2978_p4 = pnand %p4953_p9, %p4952_p0 }
 0x6b1   : > { %3561 = dma.done.wait (!%p2978_p4), %s2307_s17, 2048  }
 0x6b2   : > { %3563 = vsyncadd (!%p2978_p4), %s2307_s17, 4294965248  ;;  %s4954_s16 = sld [smem:[#allocation39_spill]]  ;;  %s4955_s24 = sld [smem:[#allocation37_spill]] }
 0x6b3   : > { %s4956_s15 = sld [smem:[#allocation40_spill]]  ;;  %s4957_s29 = smov %s3570_s30 }
 0x6b8   : > { %p38_p12 = scmp.ge.s32.totalorder %s4954_s16, 4   ;;  %s4958_s30 = smov %s4955_s24 }
 0x6ba   :  { %40 = sbr.rel (!%p38_p12) target bundleno = 28 (0x1c), region = 198 }
 0x6c1   :  { %2312 = vsyncpa [#allocation3], 1 }
 0x6c2   :  { %2314 = vsyncpa [#allocation3 + $0x1], 1 }
 0x6c3   :  { %2315 = vsyncpa [#allocation6], 1 }
 0x6c4   :  { %2317 = vsyncpa [#allocation6 + $0x1], 1 }
 0x6c5   :  { %2318 = vsyncpa [#allocation9], 1 }
 0x6c6   :  { %2320 = vsyncpa [#allocation9 + $0x1], 1 }
 0x6c7   :  { %2321 = vsyncpa [#allocation12], 1 }
 0x6c8   :  { %2322 = vsyncpa [#allocation15], 1 }
 0x6c9   :  { %2323 = vsyncpa [#allocation18], 1 }
 0x6ca   :  { %2324 = vsyncpa [#allocation21], 1 }
 0x6cb   :  { %2325 = vsyncpa [#allocation24], 1 }
 0x6cc   :  { %2326 = vsyncpa [#allocation4], 1 }
 0x6cd   :  { %2328 = vsyncpa [#allocation4 + $0x1], 1 }

</bundles_post_ra>
